<compile_context>
chip_gen: v7x
topology: tpu7x:2x2x1
jax: 0.10.0
libtpu: 0.0.40
codegen_flags: <defaults>
</compile_context>

<pallas_src>
import jax
import jax.numpy as jnp
from jax import lax
from jax.experimental import pallas as pl
from jax.experimental.pallas import tpu as pltpu

LANE = 128
SUBLANE = 8


def _round_up(x, m):
    return ((x + m - 1) // m) * m


def _evaluator_kernel(img_ref, emb_ref, fc1_wt_ref, fc1_b_ref,
                      w_ih_t_ref, bias_gi_ref, w_hh_t_ref, b_hn_ref,
                      fc2_w_ref, fc2_b_ref, out_ref, gi_scratch):
    # img_ref:    (BB, P, Dc)   image region features (one batch block)
    # emb_ref:    (T, BB, E)    time-major token embeddings (one batch block)
    # fc1_wt:     (Dc, E)       fc1 weight, transposed
    # fc1_b:      (1, E)
    # w_ih_t:     (E, 3*Hp)     GRU input weights, transposed, gates [r|z|n],
    #                           each gate padded to Hp=round_up(H,128) lanes
    # bias_gi:    (1, 3*Hp)     folded bias: [b_ir+b_hr | b_iz+b_hz | b_in]
    # w_hh_t:     (Hp, 3*Hp)    GRU hidden weights, transposed, padded gate layout
    # b_hn:       (1, Hp)       b_hn (must stay inside r*(...) per GRU definition)
    # fc2_w:      (1, Hp)       fc2 weight with 1/(T+1) time average folded in
    # fc2_b:      (1, 1)
    # out_ref:    (BB, 1)
    # gi_scratch: ((T+1)*BB, 3*Hp)  VMEM scratch holding the hoisted projection
    BB, P, _ = img_ref.shape
    T, _, E = emb_ref.shape
    Hp = w_hh_t_ref.shape[0]
    n_steps = T + 1
    mm_dtype = w_ih_t_ref.dtype

    # --- avg_pool1d over the region axis + fc1 (off the critical path) ---
    img_mean = jnp.mean(img_ref[...].astype(jnp.float32), axis=1)          # (BB, Dc)
    x0 = jnp.dot(img_mean.astype(mm_dtype), fc1_wt_ref[...],
                 preferred_element_type=jnp.float32) + fc1_b_ref[...]       # (BB, E)

    # --- hoisted input-side GRU projection for all T+1 steps ---
    bias_gi = bias_gi_ref[...]
    gi_scratch[pl.ds(0, BB), :] = (
        jnp.dot(x0.astype(mm_dtype), w_ih_t_ref[...],
                preferred_element_type=jnp.float32) + bias_gi)
    if T > 0:
        emb_flat = emb_ref[...].reshape(T * BB, E)       # layout-free collapse
        gi_scratch[pl.ds(BB, T * BB), :] = (
            jnp.dot(emb_flat.astype(mm_dtype), w_ih_t_ref[...],
                    preferred_element_type=jnp.float32) + bias_gi)

    w_hh_t = w_hh_t_ref[...]
    b_hn = jnp.broadcast_to(b_hn_ref[...], (BB, Hp))     # hoisted broadcast

    # --- recurrence: only h @ w_hh_t is sequential ---
    def step(t, carry):
        h, hsum = carry
        start = pl.multiple_of(t * BB, BB)
        gi = gi_scratch[pl.ds(start, BB), :]                                # (BB, 3Hp)
        gh = jnp.dot(h.astype(mm_dtype), w_hh_t,
                     preferred_element_type=jnp.float32)                    # (BB, 3Hp)
        # lane-aligned gate slices (multiples of 128)
        r = jax.nn.sigmoid(gi[:, 0:Hp] + gh[:, 0:Hp])
        z = jax.nn.sigmoid(gi[:, Hp:2 * Hp] + gh[:, Hp:2 * Hp])
        n = jnp.tanh(gi[:, 2 * Hp:3 * Hp] + r * (gh[:, 2 * Hp:3 * Hp] + b_hn))
        h_new = (1.0 - z) * n + z * h
        return h_new, hsum + h_new

    zeros = jnp.zeros((BB, Hp), jnp.float32)
    # Full unroll for small blocks (cross-step MXU/EUP overlap); modest unroll
    # for large blocks to bound vreg pressure (live set ~2x per BB doubling).
    unroll = n_steps if BB <= 32 else 2
    _, hsum = lax.fori_loop(0, n_steps, step, (zeros, zeros), unroll=unroll)

    # --- fc2 (1/(T+1) already folded into fc2_w) + sigmoid ---
    logit = jnp.sum(hsum * fc2_w_ref[...], axis=-1, keepdims=True) + fc2_b_ref[...]
    out_ref[...] = jax.nn.sigmoid(logit)


def evaluator_forward(params, img_feats, target_seq, max_len=None,
                      matmul_dtype=jnp.float32):
    """JAX wrapper matching Evaluator.forward(img_feats, target_seq, max_len).

    matmul_dtype: set to jnp.bfloat16 on v6e/v7x for ~2x MXU throughput
    (f32 accumulation is kept); default f32 matches the reference tightly.
    """
    del max_len  # unused by the reference forward as well
    V, E = params["embedding"].shape
    H = params["w_hh_t"].shape[0]
    Dc = params["fc1_wt"].shape[0]
    B, P, _ = img_feats.shape
    T = target_seq.shape[1]

    Hp = _round_up(H, LANE)          # gate block padded to lane width

    # Batch-block sizing: 32-64 rows per block amortizes per-grid-step overhead
    # and fills the MXU; keep >=2 blocks for large batches so v7x's 2nd
    # TensorCore gets work; never pad a tiny batch past the sublane multiple.
    Bp0 = _round_up(B, SUBLANE)
    if Bp0 <= 64:
        BB = Bp0
    else:
        n_blocks = max(2, pl.cdiv(Bp0, 64))
        BB = _round_up(pl.cdiv(Bp0, n_blocks), SUBLANE)
    Bp = BB * pl.cdiv(B, BB)

    # --- embedding gather; remap padding_idx=-1 to the zeroed row V-1 ---
    seq = jnp.where(target_seq < 0, V - 1, target_seq).astype(jnp.int32)
    emb = jnp.take(params["embedding"], seq, axis=0)                         # (B, T, E)
    emb_tbe = jnp.transpose(emb, (1, 0, 2)).astype(matmul_dtype)             # (T, B, E)
    emb_p = jnp.zeros((T, Bp, E), matmul_dtype).at[:, :B].set(emb_tbe)

    img_p = jnp.zeros((Bp, P, Dc), matmul_dtype).at[:B].set(
        img_feats.astype(matmul_dtype))

    # --- pad GRU weights into lane-aligned gate blocks, fold biases ---
    def pad_gate_cols(w, rows_to=None):
        K = w.shape[0]
        Kp = K if rows_to is None else rows_to
        out = jnp.zeros((Kp, 3 * Hp), jnp.float32)
        for g in range(3):
            out = out.at[:K, g * Hp:g * Hp + H].set(w[:, g * H:(g + 1) * H])
        return out.astype(matmul_dtype)

    w_ih_tp = pad_gate_cols(params["w_ih_t"])                 # (E, 3Hp)
    w_hh_tp = pad_gate_cols(params["w_hh_t"], rows_to=Hp)     # (Hp, 3Hp)

    b_ih = params["b_ih"][0]
    b_hh = params["b_hh"][0]
    bias_gi = jnp.zeros((1, 3 * Hp), jnp.float32)
    bias_gi = bias_gi.at[0, 0 * Hp:0 * Hp + H].set(b_ih[0:H] + b_hh[0:H])          # r
    bias_gi = bias_gi.at[0, 1 * Hp:1 * Hp + H].set(b_ih[H:2 * H] + b_hh[H:2 * H])  # z
    bias_gi = bias_gi.at[0, 2 * Hp:2 * Hp + H].set(b_ih[2 * H:3 * H])              # n
    b_hn = jnp.zeros((1, Hp), jnp.float32).at[0, :H].set(b_hh[2 * H:3 * H])

    # fc2 with the 1/(T+1) time-average folded in
    fc2_w = jnp.zeros((1, Hp), jnp.float32).at[0, :H].set(
        params["fc2_w"][0] / float(T + 1))
    fc2_b = params["fc2_b"].astype(jnp.float32)
    fc1_wt = params["fc1_wt"].astype(matmul_dtype)
    fc1_b = params["fc1_b"].astype(jnp.float32)

    grid = (Bp // BB,)
    in_specs = [
        pl.BlockSpec((BB, P, Dc), lambda i: (i, 0, 0)),       # img
        pl.BlockSpec((T, BB, E), lambda i: (0, i, 0)),        # emb (time-major)
        pl.BlockSpec((Dc, E), lambda i: (0, 0)),              # fc1_wt
        pl.BlockSpec((1, E), lambda i: (0, 0)),               # fc1_b
        pl.BlockSpec((E, 3 * Hp), lambda i: (0, 0)),          # w_ih_t (padded gates)
        pl.BlockSpec((1, 3 * Hp), lambda i: (0, 0)),          # folded gi bias
        pl.BlockSpec((Hp, 3 * Hp), lambda i: (0, 0)),         # w_hh_t (padded gates)
        pl.BlockSpec((1, Hp), lambda i: (0, 0)),              # b_hn
        pl.BlockSpec((1, Hp), lambda i: (0, 0)),              # fc2_w (scaled)
        pl.BlockSpec((1, 1), lambda i: (0, 0)),               # fc2_b
    ]
    out_specs = pl.BlockSpec((BB, 1), lambda i: (i, 0))

    flops = int(2 * Bp * P * Dc + 2 * Bp * Dc * E
                + 2 * (T + 1) * Bp * E * 3 * Hp
                + 2 * (T + 1) * Bp * Hp * 3 * Hp
                + 12 * (T + 1) * Bp * Hp + 2 * Bp * Hp)
    transcendentals = int(3 * (T + 1) * Bp * Hp + Bp)
    bytes_accessed = int(4 * (Bp * P * Dc + T * Bp * E + Dc * E + E
                              + E * 3 * Hp + 3 * Hp + Hp * 3 * Hp
                              + 2 * Hp + 1 + Bp))

    out = pl.pallas_call(
        _evaluator_kernel,
        out_shape=jax.ShapeDtypeStruct((Bp, 1), jnp.float32),
        grid=grid,
        in_specs=in_specs,
        out_specs=out_specs,
        scratch_shapes=[pltpu.VMEM(((T + 1) * BB, 3 * Hp), jnp.float32)],
        compiler_params=pltpu.CompilerParams(
            dimension_semantics=("parallel",),
            vmem_limit_bytes=32 * 1024 * 1024),
        cost_estimate=pl.CostEstimate(flops=flops,
                                      transcendentals=transcendentals,
                                      bytes_accessed=bytes_accessed),
    )(img_p, emb_p, fc1_wt, fc1_b, w_ih_tp, bias_gi, w_hh_tp, b_hn, fc2_w, fc2_b)
    return out[:B, 0]


def evaluator_reference(params, img_feats, target_seq):
    """Pure-JAX reference used to validate the kernel."""
    V = params["embedding"].shape[0]
    H = params["w_hh_t"].shape[0]
    img_mean = jnp.mean(img_feats, axis=1)
    x0 = img_mean @ params["fc1_wt"] + params["fc1_b"][0]
    seq = jnp.where(target_seq < 0, V - 1, target_seq).astype(jnp.int32)
    emb = jnp.take(params["embedding"], seq, axis=0)
    inputs = jnp.concatenate([x0[:, None, :], emb], axis=1)          # (B, T+1, E)

    def step(h, x):
        gi = x @ params["w_ih_t"] + params["b_ih"][0]
        gh = h @ params["w_hh_t"] + params["b_hh"][0]
        r = jax.nn.sigmoid(gi[:, :H] + gh[:, :H])
        z = jax.nn.sigmoid(gi[:, H:2 * H] + gh[:, H:2 * H])
        n = jnp.tanh(gi[:, 2 * H:] + r * gh[:, 2 * H:])
        h = (1.0 - z) * n + z * h
        return h, h

    h0 = jnp.zeros((inputs.shape[0], H), jnp.float32)
    _, hs = lax.scan(step, h0, jnp.transpose(inputs, (1, 0, 2)))
    h_mean = jnp.mean(hs, axis=0)
    logit = jnp.sum(h_mean * params["fc2_w"], axis=-1) + params["fc2_b"][0, 0]
    return jax.nn.sigmoid(logit)


def init_params(key, embedding_dim, encoder_dim, gru_units, vocab_size):
    E, Dc, H, V = embedding_dim, encoder_dim, gru_units, vocab_size
    ks = jax.random.split(key, 10)

    def unif(k, shape, fan_in):
        bound = 1.0 / jnp.sqrt(float(fan_in))
        return jax.random.uniform(k, shape, jnp.float32, -bound, bound)

    emb_table = jax.random.normal(ks[0], (V, E), jnp.float32)
    emb_table = emb_table.at[V - 1].set(0.0)   # padding_idx=-1 -> row V-1 zeroed

    params = {
        "embedding": emb_table,
        # fc1: Linear(encoder_dim -> embedding_dim), stored transposed (Dc, E)
        "fc1_wt": unif(ks[1], (Dc, E), Dc),
        "fc1_b":  unif(ks[2], (1, E), Dc),
        # GRU: weight_ih (3H, E) / weight_hh (3H, H), stored transposed; gates [r|z|n]
        "w_ih_t": unif(ks[3], (E, 3 * H), H),
        "w_hh_t": unif(ks[4], (H, 3 * H), H),
        "b_ih":   unif(ks[5], (1, 3 * H), H),
        "b_hh":   unif(ks[6], (1, 3 * H), H),
        # fc2: Linear(gru_units -> 1)
        "fc2_w":  unif(ks[7], (1, H), H),
        "fc2_b":  unif(ks[8], (1, 1), H),
    }
    return params


if __name__ == "__main__":
    B, P = 2, 16                 # batch, number of image regions
    encoder_dim = 64
    embedding_dim = 32
    gru_units = 32
    vocab_size = 50
    T = 8                        # target sequence length

    root = jax.random.PRNGKey(0)
    k_params, k_img, k_seq = jax.random.split(root, 3)

    params = init_params(k_params, embedding_dim, encoder_dim, gru_units, vocab_size)
    img_feats = jax.random.normal(k_img, (B, P, encoder_dim), jnp.float32)
    target_seq = jax.random.randint(k_seq, (B, T), 0, vocab_size, jnp.int32)

    pred = evaluator_forward(params, img_feats, target_seq, max_len=T)
    pred = jax.block_until_ready(pred)

    ref = evaluator_reference(params, img_feats, target_seq)
    assert pred.shape == (B,), pred.shape
    assert jnp.allclose(pred, ref, atol=1e-3, rtol=1e-3), (pred, ref)

    # TODO(synk): on v6e/v7x pass matmul_dtype=jnp.bfloat16 (f32 accumulation is
    # kept) and loosen the tolerance to ~3e-3; kept f32 here so numerics match
    # the reference tightly on all generations.
    print("KERNEL_OK")
</pallas_src>

<mosaic_0001>
module attributes {stable_mosaic.version = 11 : i64} {
  func.func @_evaluator_kernel(%arg0: i32, %arg1: memref<8x16x64xf32, #tpu.memory_space<vmem>>, %arg2: memref<8x8x32xf32, #tpu.memory_space<vmem>>, %arg3: memref<64x32xf32, #tpu.memory_space<vmem>>, %arg4: memref<1x32xf32, #tpu.memory_space<vmem>>, %arg5: memref<32x384xf32, #tpu.memory_space<vmem>>, %arg6: memref<1x384xf32, #tpu.memory_space<vmem>>, %arg7: memref<128x384xf32, #tpu.memory_space<vmem>>, %arg8: memref<1x128xf32, #tpu.memory_space<vmem>>, %arg9: memref<1x128xf32, #tpu.memory_space<vmem>>, %arg10: memref<1x1xf32, #tpu.memory_space<vmem>>, %arg11: memref<8x1xf32, #tpu.memory_space<vmem>>, %arg12: memref<72x384xf32, #tpu.memory_space<vmem>>) attributes {dimension_semantics = [#tpu.dimension_semantics<parallel>], iteration_bounds = array<i64: 1>, scalar_prefetch = 0 : i64, scratch_operands = 1 : i64, tpu.core_type = #tpu.core_type<tc>, window_params = [{transform_indices = @transform_0, window_bounds = array<i64: 8, 16, 64>}, {transform_indices = @transform_1, window_bounds = array<i64: 8, 8, 32>}, {pipeline_mode = #tpu.pipeline_mode<synchronous>, transform_indices = @transform_2, window_bounds = array<i64: 64, 32>}, {pipeline_mode = #tpu.pipeline_mode<synchronous>, transform_indices = @transform_3, window_bounds = array<i64: 1, 32>}, {pipeline_mode = #tpu.pipeline_mode<synchronous>, transform_indices = @transform_4, window_bounds = array<i64: 32, 384>}, {pipeline_mode = #tpu.pipeline_mode<synchronous>, transform_indices = @transform_5, window_bounds = array<i64: 1, 384>}, {pipeline_mode = #tpu.pipeline_mode<synchronous>, transform_indices = @transform_6, window_bounds = array<i64: 128, 384>}, {pipeline_mode = #tpu.pipeline_mode<synchronous>, transform_indices = @transform_7, window_bounds = array<i64: 1, 128>}, {pipeline_mode = #tpu.pipeline_mode<synchronous>, transform_indices = @transform_8, window_bounds = array<i64: 1, 128>}, {pipeline_mode = #tpu.pipeline_mode<synchronous>, transform_indices = @transform_9, window_bounds = array<i64: 1, 1>}, {transform_indices = @transform_10, window_bounds = array<i64: 8, 1>}]} {
    %c0 = arith.constant 0 : index
    %c0_0 = arith.constant 0 : index
    %c0_1 = arith.constant 0 : index
    %0 = vector.load %arg1[%c0, %c0_0, %c0_1] : memref<8x16x64xf32, #tpu.memory_space<vmem>>, vector<8x16x64xf32>
    %cst = arith.constant dense<0.000000e+00> : vector<8x64xf32>
    %1 = vector.multi_reduction <add>, %0, %cst [1] : vector<8x16x64xf32> to vector<8x64xf32>
    %cst_2 = arith.constant 1.600000e+01 : f32
    %2 = vector.broadcast %cst_2 : f32 to vector<8x64xf32>
    %3 = arith.divf %1, %2 : vector<8x64xf32>
    %c0_3 = arith.constant 0 : index
    %c0_4 = arith.constant 0 : index
    %4 = vector.load %arg3[%c0_3, %c0_4] : memref<64x32xf32, #tpu.memory_space<vmem>>, vector<64x32xf32>
    %cst_5 = arith.constant dense<0.000000e+00> : vector<8x32xf32>
    %5 = tpu.matmul %3, %4, %cst_5 {dimension_numbers = #tpu.dot_dimension_numbers<[1], [0], [0], [1], [0, 0, 1, 1], [], []>} : vector<8x64xf32>, vector<64x32xf32>, vector<8x32xf32> -> vector<8x32xf32>
    %c0_6 = arith.constant 0 : index
    %c0_7 = arith.constant 0 : index
    %6 = vector.load %arg4[%c0_6, %c0_7] : memref<1x32xf32, #tpu.memory_space<vmem>>, vector<1x32xf32>
    %7 = vector.broadcast %6 : vector<1x32xf32> to vector<8x32xf32>
    %8 = arith.addf %5, %7 : vector<8x32xf32>
    %c0_8 = arith.constant 0 : index
    %c0_9 = arith.constant 0 : index
    %9 = vector.load %arg6[%c0_8, %c0_9] : memref<1x384xf32, #tpu.memory_space<vmem>>, vector<1x384xf32>
    %c0_10 = arith.constant 0 : index
    %c0_11 = arith.constant 0 : index
    %10 = vector.load %arg5[%c0_10, %c0_11] : memref<32x384xf32, #tpu.memory_space<vmem>>, vector<32x384xf32>
    %cst_12 = arith.constant dense<0.000000e+00> : vector<8x384xf32>
    %11 = tpu.matmul %8, %10, %cst_12 {dimension_numbers = #tpu.dot_dimension_numbers<[1], [0], [0], [1], [0, 0, 1, 1], [], []>} : vector<8x32xf32>, vector<32x384xf32>, vector<8x384xf32> -> vector<8x384xf32>
    %12 = vector.broadcast %9 : vector<1x384xf32> to vector<8x384xf32>
    %13 = arith.addf %11, %12 : vector<8x384xf32>
    %c0_13 = arith.constant 0 : index
    %c0_14 = arith.constant 0 : index
    %14 = vector.load %arg12[%c0_13, %c0_14] : memref<72x384xf32, #tpu.memory_space<vmem>>, vector<8x384xf32>
    tpu.vector_store %arg12[%c0_13, %c0_14], %13 {strides = array<i32>} : memref<72x384xf32, #tpu.memory_space<vmem>>, vector<8x384xf32>,
    %c0_15 = arith.constant 0 : index
    %c0_16 = arith.constant 0 : index
    %c0_17 = arith.constant 0 : index
    %15 = vector.load %arg2[%c0_15, %c0_16, %c0_17] : memref<8x8x32xf32, #tpu.memory_space<vmem>>, vector<8x8x32xf32>
    %16 = vector.shape_cast %15 : vector<8x8x32xf32> to vector<64x32xf32>
    %c0_18 = arith.constant 0 : index
    %c0_19 = arith.constant 0 : index
    %17 = vector.load %arg5[%c0_18, %c0_19] : memref<32x384xf32, #tpu.memory_space<vmem>>, vector<32x384xf32>
    %cst_20 = arith.constant dense<0.000000e+00> : vector<64x384xf32>
    %18 = tpu.matmul %16, %17, %cst_20 {dimension_numbers = #tpu.dot_dimension_numbers<[1], [0], [0], [1], [0, 0, 1, 1], [], []>} : vector<64x32xf32>, vector<32x384xf32>, vector<64x384xf32> -> vector<64x384xf32>
    %19 = vector.broadcast %9 : vector<1x384xf32> to vector<64x384xf32>
    %20 = arith.addf %18, %19 : vector<64x384xf32>
    %c8 = arith.constant 8 : index
    %c0_21 = arith.constant 0 : index
    %21 = vector.load %arg12[%c8, %c0_21] : memref<72x384xf32, #tpu.memory_space<vmem>>, vector<64x384xf32>
    tpu.vector_store %arg12[%c8, %c0_21], %20 {strides = array<i32>} : memref<72x384xf32, #tpu.memory_space<vmem>>, vector<64x384xf32>,
    %c0_22 = arith.constant 0 : index
    %c0_23 = arith.constant 0 : index
    %22 = vector.load %arg7[%c0_22, %c0_23] : memref<128x384xf32, #tpu.memory_space<vmem>>, vector<128x384xf32>
    %c0_24 = arith.constant 0 : index
    %c0_25 = arith.constant 0 : index
    %23 = vector.load %arg8[%c0_24, %c0_25] : memref<1x128xf32, #tpu.memory_space<vmem>>, vector<1x128xf32>
    %24 = vector.shape_cast %23 : vector<1x128xf32> to vector<1x128xf32>
    %25 = vector.broadcast %24 : vector<1x128xf32> to vector<8x128xf32>
    %cst_26 = arith.constant 0.000000e+00 : f32
    %26 = vector.broadcast %cst_26 : f32 to vector<8x128xf32>
    %c0_i32 = arith.constant 0 : i32
    %c8_i32 = arith.constant 8 : i32
    %27 = arith.muli %c0_i32, %c8_i32 : i32
    %28 = tpu.assume_multiple %27, 8 : i32
    %29 = arith.index_cast %28 : i32 to index
    %c0_27 = arith.constant 0 : index
    %30 = vector.load %arg12[%29, %c0_27] : memref<72x384xf32, #tpu.memory_space<vmem>>, vector<8x384xf32>
    %cst_28 = arith.constant dense<0.000000e+00> : vector<8x384xf32>
    %31 = tpu.matmul %26, %22, %cst_28 {dimension_numbers = #tpu.dot_dimension_numbers<[1], [0], [0], [1], [0, 0, 1, 1], [], []>} : vector<8x128xf32>, vector<128x384xf32>, vector<8x384xf32> -> vector<8x384xf32>
    %32 = vector.extract_strided_slice %30 {offsets = [0, 0], sizes = [8, 128], strides = [1, 1]} : vector<8x384xf32> to vector<8x128xf32>
    %33 = vector.extract_strided_slice %31 {offsets = [0, 0], sizes = [8, 128], strides = [1, 1]} : vector<8x384xf32> to vector<8x128xf32>
    %34 = arith.addf %32, %33 : vector<8x128xf32>
    %35 = arith.negf %34 : vector<8x128xf32>
    %36 = math.exp %35 : vector<8x128xf32>
    %cst_29 = arith.constant 1.000000e+00 : f32
    %37 = vector.broadcast %cst_29 : f32 to vector<8x128xf32>
    %38 = arith.addf %37, %36 : vector<8x128xf32>
    %39 = arith.divf %37, %38 : vector<8x128xf32>
    %40 = vector.extract_strided_slice %30 {offsets = [0, 128], sizes = [8, 128], strides = [1, 1]} : vector<8x384xf32> to vector<8x128xf32>
    %41 = vector.extract_strided_slice %31 {offsets = [0, 128], sizes = [8, 128], strides = [1, 1]} : vector<8x384xf32> to vector<8x128xf32>
    %42 = arith.addf %40, %41 : vector<8x128xf32>
    %43 = arith.negf %42 : vector<8x128xf32>
    %44 = math.exp %43 : vector<8x128xf32>
    %cst_30 = arith.constant 1.000000e+00 : f32
    %45 = vector.broadcast %cst_30 : f32 to vector<8x128xf32>
    %46 = arith.addf %45, %44 : vector<8x128xf32>
    %47 = arith.divf %45, %46 : vector<8x128xf32>
    %48 = vector.extract_strided_slice %30 {offsets = [0, 256], sizes = [8, 128], strides = [1, 1]} : vector<8x384xf32> to vector<8x128xf32>
    %49 = vector.extract_strided_slice %31 {offsets = [0, 256], sizes = [8, 128], strides = [1, 1]} : vector<8x384xf32> to vector<8x128xf32>
    %50 = arith.addf %49, %25 : vector<8x128xf32>
    %51 = arith.mulf %39, %50 : vector<8x128xf32>
    %52 = arith.addf %48, %51 : vector<8x128xf32>
    %53 = math.tanh %52 : vector<8x128xf32>
    %cst_31 = arith.constant 1.000000e+00 : f32
    %54 = vector.broadcast %cst_31 : f32 to vector<8x128xf32>
    %55 = arith.subf %54, %47 : vector<8x128xf32>
    %56 = arith.mulf %55, %53 : vector<8x128xf32>
    %57 = arith.mulf %47, %26 : vector<8x128xf32>
    %58 = arith.addf %56, %57 : vector<8x128xf32>
    %59 = arith.addf %26, %58 : vector<8x128xf32>
    %c1_i32 = arith.constant 1 : i32
    %c8_i32_32 = arith.constant 8 : i32
    %60 = arith.muli %c1_i32, %c8_i32_32 : i32
    %61 = tpu.assume_multiple %60, 8 : i32
    %62 = arith.index_cast %61 : i32 to index
    %c0_33 = arith.constant 0 : index
    %63 = vector.load %arg12[%62, %c0_33] : memref<72x384xf32, #tpu.memory_space<vmem>>, vector<8x384xf32>
    %cst_34 = arith.constant dense<0.000000e+00> : vector<8x384xf32>
    %64 = tpu.matmul %58, %22, %cst_34 {dimension_numbers = #tpu.dot_dimension_numbers<[1], [0], [0], [1], [0, 0, 1, 1], [], []>} : vector<8x128xf32>, vector<128x384xf32>, vector<8x384xf32> -> vector<8x384xf32>
    %65 = vector.extract_strided_slice %63 {offsets = [0, 0], sizes = [8, 128], strides = [1, 1]} : vector<8x384xf32> to vector<8x128xf32>
    %66 = vector.extract_strided_slice %64 {offsets = [0, 0], sizes = [8, 128], strides = [1, 1]} : vector<8x384xf32> to vector<8x128xf32>
    %67 = arith.addf %65, %66 : vector<8x128xf32>
    %68 = arith.negf %67 : vector<8x128xf32>
    %69 = math.exp %68 : vector<8x128xf32>
    %cst_35 = arith.constant 1.000000e+00 : f32
    %70 = vector.broadcast %cst_35 : f32 to vector<8x128xf32>
    %71 = arith.addf %70, %69 : vector<8x128xf32>
    %72 = arith.divf %70, %71 : vector<8x128xf32>
    %73 = vector.extract_strided_slice %63 {offsets = [0, 128], sizes = [8, 128], strides = [1, 1]} : vector<8x384xf32> to vector<8x128xf32>
    %74 = vector.extract_strided_slice %64 {offsets = [0, 128], sizes = [8, 128], strides = [1, 1]} : vector<8x384xf32> to vector<8x128xf32>
    %75 = arith.addf %73, %74 : vector<8x128xf32>
    %76 = arith.negf %75 : vector<8x128xf32>
    %77 = math.exp %76 : vector<8x128xf32>
    %cst_36 = arith.constant 1.000000e+00 : f32
    %78 = vector.broadcast %cst_36 : f32 to vector<8x128xf32>
    %79 = arith.addf %78, %77 : vector<8x128xf32>
    %80 = arith.divf %78, %79 : vector<8x128xf32>
    %81 = vector.extract_strided_slice %63 {offsets = [0, 256], sizes = [8, 128], strides = [1, 1]} : vector<8x384xf32> to vector<8x128xf32>
    %82 = vector.extract_strided_slice %64 {offsets = [0, 256], sizes = [8, 128], strides = [1, 1]} : vector<8x384xf32> to vector<8x128xf32>
    %83 = arith.addf %82, %25 : vector<8x128xf32>
    %84 = arith.mulf %72, %83 : vector<8x128xf32>
    %85 = arith.addf %81, %84 : vector<8x128xf32>
    %86 = math.tanh %85 : vector<8x128xf32>
    %cst_37 = arith.constant 1.000000e+00 : f32
    %87 = vector.broadcast %cst_37 : f32 to vector<8x128xf32>
    %88 = arith.subf %87, %80 : vector<8x128xf32>
    %89 = arith.mulf %88, %86 : vector<8x128xf32>
    %90 = arith.mulf %80, %58 : vector<8x128xf32>
    %91 = arith.addf %89, %90 : vector<8x128xf32>
    %92 = arith.addf %59, %91 : vector<8x128xf32>
    %c2_i32 = arith.constant 2 : i32
    %c8_i32_38 = arith.constant 8 : i32
    %93 = arith.muli %c2_i32, %c8_i32_38 : i32
    %94 = tpu.assume_multiple %93, 8 : i32
    %95 = arith.index_cast %94 : i32 to index
    %c0_39 = arith.constant 0 : index
    %96 = vector.load %arg12[%95, %c0_39] : memref<72x384xf32, #tpu.memory_space<vmem>>, vector<8x384xf32>
    %cst_40 = arith.constant dense<0.000000e+00> : vector<8x384xf32>
    %97 = tpu.matmul %91, %22, %cst_40 {dimension_numbers = #tpu.dot_dimension_numbers<[1], [0], [0], [1], [0, 0, 1, 1], [], []>} : vector<8x128xf32>, vector<128x384xf32>, vector<8x384xf32> -> vector<8x384xf32>
    %98 = vector.extract_strided_slice %96 {offsets = [0, 0], sizes = [8, 128], strides = [1, 1]} : vector<8x384xf32> to vector<8x128xf32>
    %99 = vector.extract_strided_slice %97 {offsets = [0, 0], sizes = [8, 128], strides = [1, 1]} : vector<8x384xf32> to vector<8x128xf32>
    %100 = arith.addf %98, %99 : vector<8x128xf32>
    %101 = arith.negf %100 : vector<8x128xf32>
    %102 = math.exp %101 : vector<8x128xf32>
    %cst_41 = arith.constant 1.000000e+00 : f32
    %103 = vector.broadcast %cst_41 : f32 to vector<8x128xf32>
    %104 = arith.addf %103, %102 : vector<8x128xf32>
    %105 = arith.divf %103, %104 : vector<8x128xf32>
    %106 = vector.extract_strided_slice %96 {offsets = [0, 128], sizes = [8, 128], strides = [1, 1]} : vector<8x384xf32> to vector<8x128xf32>
    %107 = vector.extract_strided_slice %97 {offsets = [0, 128], sizes = [8, 128], strides = [1, 1]} : vector<8x384xf32> to vector<8x128xf32>
    %108 = arith.addf %106, %107 : vector<8x128xf32>
    %109 = arith.negf %108 : vector<8x128xf32>
    %110 = math.exp %109 : vector<8x128xf32>
    %cst_42 = arith.constant 1.000000e+00 : f32
    %111 = vector.broadcast %cst_42 : f32 to vector<8x128xf32>
    %112 = arith.addf %111, %110 : vector<8x128xf32>
    %113 = arith.divf %111, %112 : vector<8x128xf32>
    %114 = vector.extract_strided_slice %96 {offsets = [0, 256], sizes = [8, 128], strides = [1, 1]} : vector<8x384xf32> to vector<8x128xf32>
    %115 = vector.extract_strided_slice %97 {offsets = [0, 256], sizes = [8, 128], strides = [1, 1]} : vector<8x384xf32> to vector<8x128xf32>
    %116 = arith.addf %115, %25 : vector<8x128xf32>
    %117 = arith.mulf %105, %116 : vector<8x128xf32>
    %118 = arith.addf %114, %117 : vector<8x128xf32>
    %119 = math.tanh %118 : vector<8x128xf32>
    %cst_43 = arith.constant 1.000000e+00 : f32
    %120 = vector.broadcast %cst_43 : f32 to vector<8x128xf32>
    %121 = arith.subf %120, %113 : vector<8x128xf32>
    %122 = arith.mulf %121, %119 : vector<8x128xf32>
    %123 = arith.mulf %113, %91 : vector<8x128xf32>
    %124 = arith.addf %122, %123 : vector<8x128xf32>
    %125 = arith.addf %92, %124 : vector<8x128xf32>
    %c3_i32 = arith.constant 3 : i32
    %c8_i32_44 = arith.constant 8 : i32
    %126 = arith.muli %c3_i32, %c8_i32_44 : i32
    %127 = tpu.assume_multiple %126, 8 : i32
    %128 = arith.index_cast %127 : i32 to index
    %c0_45 = arith.constant 0 : index
    %129 = vector.load %arg12[%128, %c0_45] : memref<72x384xf32, #tpu.memory_space<vmem>>, vector<8x384xf32>
    %cst_46 = arith.constant dense<0.000000e+00> : vector<8x384xf32>
    %130 = tpu.matmul %124, %22, %cst_46 {dimension_numbers = #tpu.dot_dimension_numbers<[1], [0], [0], [1], [0, 0, 1, 1], [], []>} : vector<8x128xf32>, vector<128x384xf32>, vector<8x384xf32> -> vector<8x384xf32>
    %131 = vector.extract_strided_slice %129 {offsets = [0, 0], sizes = [8, 128], strides = [1, 1]} : vector<8x384xf32> to vector<8x128xf32>
    %132 = vector.extract_strided_slice %130 {offsets = [0, 0], sizes = [8, 128], strides = [1, 1]} : vector<8x384xf32> to vector<8x128xf32>
    %133 = arith.addf %131, %132 : vector<8x128xf32>
    %134 = arith.negf %133 : vector<8x128xf32>
    %135 = math.exp %134 : vector<8x128xf32>
    %cst_47 = arith.constant 1.000000e+00 : f32
    %136 = vector.broadcast %cst_47 : f32 to vector<8x128xf32>
    %137 = arith.addf %136, %135 : vector<8x128xf32>
    %138 = arith.divf %136, %137 : vector<8x128xf32>
    %139 = vector.extract_strided_slice %129 {offsets = [0, 128], sizes = [8, 128], strides = [1, 1]} : vector<8x384xf32> to vector<8x128xf32>
    %140 = vector.extract_strided_slice %130 {offsets = [0, 128], sizes = [8, 128], strides = [1, 1]} : vector<8x384xf32> to vector<8x128xf32>
    %141 = arith.addf %139, %140 : vector<8x128xf32>
    %142 = arith.negf %141 : vector<8x128xf32>
    %143 = math.exp %142 : vector<8x128xf32>
    %cst_48 = arith.constant 1.000000e+00 : f32
    %144 = vector.broadcast %cst_48 : f32 to vector<8x128xf32>
    %145 = arith.addf %144, %143 : vector<8x128xf32>
    %146 = arith.divf %144, %145 : vector<8x128xf32>
    %147 = vector.extract_strided_slice %129 {offsets = [0, 256], sizes = [8, 128], strides = [1, 1]} : vector<8x384xf32> to vector<8x128xf32>
    %148 = vector.extract_strided_slice %130 {offsets = [0, 256], sizes = [8, 128], strides = [1, 1]} : vector<8x384xf32> to vector<8x128xf32>
    %149 = arith.addf %148, %25 : vector<8x128xf32>
    %150 = arith.mulf %138, %149 : vector<8x128xf32>
    %151 = arith.addf %147, %150 : vector<8x128xf32>
    %152 = math.tanh %151 : vector<8x128xf32>
    %cst_49 = arith.constant 1.000000e+00 : f32
    %153 = vector.broadcast %cst_49 : f32 to vector<8x128xf32>
    %154 = arith.subf %153, %146 : vector<8x128xf32>
    %155 = arith.mulf %154, %152 : vector<8x128xf32>
    %156 = arith.mulf %146, %124 : vector<8x128xf32>
    %157 = arith.addf %155, %156 : vector<8x128xf32>
    %158 = arith.addf %125, %157 : vector<8x128xf32>
    %c4_i32 = arith.constant 4 : i32
    %c8_i32_50 = arith.constant 8 : i32
    %159 = arith.muli %c4_i32, %c8_i32_50 : i32
    %160 = tpu.assume_multiple %159, 8 : i32
    %161 = arith.index_cast %160 : i32 to index
    %c0_51 = arith.constant 0 : index
    %162 = vector.load %arg12[%161, %c0_51] : memref<72x384xf32, #tpu.memory_space<vmem>>, vector<8x384xf32>
    %cst_52 = arith.constant dense<0.000000e+00> : vector<8x384xf32>
    %163 = tpu.matmul %157, %22, %cst_52 {dimension_numbers = #tpu.dot_dimension_numbers<[1], [0], [0], [1], [0, 0, 1, 1], [], []>} : vector<8x128xf32>, vector<128x384xf32>, vector<8x384xf32> -> vector<8x384xf32>
    %164 = vector.extract_strided_slice %162 {offsets = [0, 0], sizes = [8, 128], strides = [1, 1]} : vector<8x384xf32> to vector<8x128xf32>
    %165 = vector.extract_strided_slice %163 {offsets = [0, 0], sizes = [8, 128], strides = [1, 1]} : vector<8x384xf32> to vector<8x128xf32>
    %166 = arith.addf %164, %165 : vector<8x128xf32>
    %167 = arith.negf %166 : vector<8x128xf32>
    %168 = math.exp %167 : vector<8x128xf32>
    %cst_53 = arith.constant 1.000000e+00 : f32
    %169 = vector.broadcast %cst_53 : f32 to vector<8x128xf32>
    %170 = arith.addf %169, %168 : vector<8x128xf32>
    %171 = arith.divf %169, %170 : vector<8x128xf32>
    %172 = vector.extract_strided_slice %162 {offsets = [0, 128], sizes = [8, 128], strides = [1, 1]} : vector<8x384xf32> to vector<8x128xf32>
    %173 = vector.extract_strided_slice %163 {offsets = [0, 128], sizes = [8, 128], strides = [1, 1]} : vector<8x384xf32> to vector<8x128xf32>
    %174 = arith.addf %172, %173 : vector<8x128xf32>
    %175 = arith.negf %174 : vector<8x128xf32>
    %176 = math.exp %175 : vector<8x128xf32>
    %cst_54 = arith.constant 1.000000e+00 : f32
    %177 = vector.broadcast %cst_54 : f32 to vector<8x128xf32>
    %178 = arith.addf %177, %176 : vector<8x128xf32>
    %179 = arith.divf %177, %178 : vector<8x128xf32>
    %180 = vector.extract_strided_slice %162 {offsets = [0, 256], sizes = [8, 128], strides = [1, 1]} : vector<8x384xf32> to vector<8x128xf32>
    %181 = vector.extract_strided_slice %163 {offsets = [0, 256], sizes = [8, 128], strides = [1, 1]} : vector<8x384xf32> to vector<8x128xf32>
    %182 = arith.addf %181, %25 : vector<8x128xf32>
    %183 = arith.mulf %171, %182 : vector<8x128xf32>
    %184 = arith.addf %180, %183 : vector<8x128xf32>
    %185 = math.tanh %184 : vector<8x128xf32>
    %cst_55 = arith.constant 1.000000e+00 : f32
    %186 = vector.broadcast %cst_55 : f32 to vector<8x128xf32>
    %187 = arith.subf %186, %179 : vector<8x128xf32>
    %188 = arith.mulf %187, %185 : vector<8x128xf32>
    %189 = arith.mulf %179, %157 : vector<8x128xf32>
    %190 = arith.addf %188, %189 : vector<8x128xf32>
    %191 = arith.addf %158, %190 : vector<8x128xf32>
    %c5_i32 = arith.constant 5 : i32
    %c8_i32_56 = arith.constant 8 : i32
    %192 = arith.muli %c5_i32, %c8_i32_56 : i32
    %193 = tpu.assume_multiple %192, 8 : i32
    %194 = arith.index_cast %193 : i32 to index
    %c0_57 = arith.constant 0 : index
    %195 = vector.load %arg12[%194, %c0_57] : memref<72x384xf32, #tpu.memory_space<vmem>>, vector<8x384xf32>
    %cst_58 = arith.constant dense<0.000000e+00> : vector<8x384xf32>
    %196 = tpu.matmul %190, %22, %cst_58 {dimension_numbers = #tpu.dot_dimension_numbers<[1], [0], [0], [1], [0, 0, 1, 1], [], []>} : vector<8x128xf32>, vector<128x384xf32>, vector<8x384xf32> -> vector<8x384xf32>
    %197 = vector.extract_strided_slice %195 {offsets = [0, 0], sizes = [8, 128], strides = [1, 1]} : vector<8x384xf32> to vector<8x128xf32>
    %198 = vector.extract_strided_slice %196 {offsets = [0, 0], sizes = [8, 128], strides = [1, 1]} : vector<8x384xf32> to vector<8x128xf32>
    %199 = arith.addf %197, %198 : vector<8x128xf32>
    %200 = arith.negf %199 : vector<8x128xf32>
    %201 = math.exp %200 : vector<8x128xf32>
    %cst_59 = arith.constant 1.000000e+00 : f32
    %202 = vector.broadcast %cst_59 : f32 to vector<8x128xf32>
    %203 = arith.addf %202, %201 : vector<8x128xf32>
    %204 = arith.divf %202, %203 : vector<8x128xf32>
    %205 = vector.extract_strided_slice %195 {offsets = [0, 128], sizes = [8, 128], strides = [1, 1]} : vector<8x384xf32> to vector<8x128xf32>
    %206 = vector.extract_strided_slice %196 {offsets = [0, 128], sizes = [8, 128], strides = [1, 1]} : vector<8x384xf32> to vector<8x128xf32>
    %207 = arith.addf %205, %206 : vector<8x128xf32>
    %208 = arith.negf %207 : vector<8x128xf32>
    %209 = math.exp %208 : vector<8x128xf32>
    %cst_60 = arith.constant 1.000000e+00 : f32
    %210 = vector.broadcast %cst_60 : f32 to vector<8x128xf32>
    %211 = arith.addf %210, %209 : vector<8x128xf32>
    %212 = arith.divf %210, %211 : vector<8x128xf32>
    %213 = vector.extract_strided_slice %195 {offsets = [0, 256], sizes = [8, 128], strides = [1, 1]} : vector<8x384xf32> to vector<8x128xf32>
    %214 = vector.extract_strided_slice %196 {offsets = [0, 256], sizes = [8, 128], strides = [1, 1]} : vector<8x384xf32> to vector<8x128xf32>
    %215 = arith.addf %214, %25 : vector<8x128xf32>
    %216 = arith.mulf %204, %215 : vector<8x128xf32>
    %217 = arith.addf %213, %216 : vector<8x128xf32>
    %218 = math.tanh %217 : vector<8x128xf32>
    %cst_61 = arith.constant 1.000000e+00 : f32
    %219 = vector.broadcast %cst_61 : f32 to vector<8x128xf32>
    %220 = arith.subf %219, %212 : vector<8x128xf32>
    %221 = arith.mulf %220, %218 : vector<8x128xf32>
    %222 = arith.mulf %212, %190 : vector<8x128xf32>
    %223 = arith.addf %221, %222 : vector<8x128xf32>
    %224 = arith.addf %191, %223 : vector<8x128xf32>
    %c6_i32 = arith.constant 6 : i32
    %c8_i32_62 = arith.constant 8 : i32
    %225 = arith.muli %c6_i32, %c8_i32_62 : i32
    %226 = tpu.assume_multiple %225, 8 : i32
    %227 = arith.index_cast %226 : i32 to index
    %c0_63 = arith.constant 0 : index
    %228 = vector.load %arg12[%227, %c0_63] : memref<72x384xf32, #tpu.memory_space<vmem>>, vector<8x384xf32>
    %cst_64 = arith.constant dense<0.000000e+00> : vector<8x384xf32>
    %229 = tpu.matmul %223, %22, %cst_64 {dimension_numbers = #tpu.dot_dimension_numbers<[1], [0], [0], [1], [0, 0, 1, 1], [], []>} : vector<8x128xf32>, vector<128x384xf32>, vector<8x384xf32> -> vector<8x384xf32>
    %230 = vector.extract_strided_slice %228 {offsets = [0, 0], sizes = [8, 128], strides = [1, 1]} : vector<8x384xf32> to vector<8x128xf32>
    %231 = vector.extract_strided_slice %229 {offsets = [0, 0], sizes = [8, 128], strides = [1, 1]} : vector<8x384xf32> to vector<8x128xf32>
    %232 = arith.addf %230, %231 : vector<8x128xf32>
    %233 = arith.negf %232 : vector<8x128xf32>
    %234 = math.exp %233 : vector<8x128xf32>
    %cst_65 = arith.constant 1.000000e+00 : f32
    %235 = vector.broadcast %cst_65 : f32 to vector<8x128xf32>
    %236 = arith.addf %235, %234 : vector<8x128xf32>
    %237 = arith.divf %235, %236 : vector<8x128xf32>
    %238 = vector.extract_strided_slice %228 {offsets = [0, 128], sizes = [8, 128], strides = [1, 1]} : vector<8x384xf32> to vector<8x128xf32>
    %239 = vector.extract_strided_slice %229 {offsets = [0, 128], sizes = [8, 128], strides = [1, 1]} : vector<8x384xf32> to vector<8x128xf32>
    %240 = arith.addf %238, %239 : vector<8x128xf32>
    %241 = arith.negf %240 : vector<8x128xf32>
    %242 = math.exp %241 : vector<8x128xf32>
    %cst_66 = arith.constant 1.000000e+00 : f32
    %243 = vector.broadcast %cst_66 : f32 to vector<8x128xf32>
    %244 = arith.addf %243, %242 : vector<8x128xf32>
    %245 = arith.divf %243, %244 : vector<8x128xf32>
    %246 = vector.extract_strided_slice %228 {offsets = [0, 256], sizes = [8, 128], strides = [1, 1]} : vector<8x384xf32> to vector<8x128xf32>
    %247 = vector.extract_strided_slice %229 {offsets = [0, 256], sizes = [8, 128], strides = [1, 1]} : vector<8x384xf32> to vector<8x128xf32>
    %248 = arith.addf %247, %25 : vector<8x128xf32>
    %249 = arith.mulf %237, %248 : vector<8x128xf32>
    %250 = arith.addf %246, %249 : vector<8x128xf32>
    %251 = math.tanh %250 : vector<8x128xf32>
    %cst_67 = arith.constant 1.000000e+00 : f32
    %252 = vector.broadcast %cst_67 : f32 to vector<8x128xf32>
    %253 = arith.subf %252, %245 : vector<8x128xf32>
    %254 = arith.mulf %253, %251 : vector<8x128xf32>
    %255 = arith.mulf %245, %223 : vector<8x128xf32>
    %256 = arith.addf %254, %255 : vector<8x128xf32>
    %257 = arith.addf %224, %256 : vector<8x128xf32>
    %c7_i32 = arith.constant 7 : i32
    %c8_i32_68 = arith.constant 8 : i32
    %258 = arith.muli %c7_i32, %c8_i32_68 : i32
    %259 = tpu.assume_multiple %258, 8 : i32
    %260 = arith.index_cast %259 : i32 to index
    %c0_69 = arith.constant 0 : index
    %261 = vector.load %arg12[%260, %c0_69] : memref<72x384xf32, #tpu.memory_space<vmem>>, vector<8x384xf32>
    %cst_70 = arith.constant dense<0.000000e+00> : vector<8x384xf32>
    %262 = tpu.matmul %256, %22, %cst_70 {dimension_numbers = #tpu.dot_dimension_numbers<[1], [0], [0], [1], [0, 0, 1, 1], [], []>} : vector<8x128xf32>, vector<128x384xf32>, vector<8x384xf32> -> vector<8x384xf32>
    %263 = vector.extract_strided_slice %261 {offsets = [0, 0], sizes = [8, 128], strides = [1, 1]} : vector<8x384xf32> to vector<8x128xf32>
    %264 = vector.extract_strided_slice %262 {offsets = [0, 0], sizes = [8, 128], strides = [1, 1]} : vector<8x384xf32> to vector<8x128xf32>
    %265 = arith.addf %263, %264 : vector<8x128xf32>
    %266 = arith.negf %265 : vector<8x128xf32>
    %267 = math.exp %266 : vector<8x128xf32>
    %cst_71 = arith.constant 1.000000e+00 : f32
    %268 = vector.broadcast %cst_71 : f32 to vector<8x128xf32>
    %269 = arith.addf %268, %267 : vector<8x128xf32>
    %270 = arith.divf %268, %269 : vector<8x128xf32>
    %271 = vector.extract_strided_slice %261 {offsets = [0, 128], sizes = [8, 128], strides = [1, 1]} : vector<8x384xf32> to vector<8x128xf32>
    %272 = vector.extract_strided_slice %262 {offsets = [0, 128], sizes = [8, 128], strides = [1, 1]} : vector<8x384xf32> to vector<8x128xf32>
    %273 = arith.addf %271, %272 : vector<8x128xf32>
    %274 = arith.negf %273 : vector<8x128xf32>
    %275 = math.exp %274 : vector<8x128xf32>
    %cst_72 = arith.constant 1.000000e+00 : f32
    %276 = vector.broadcast %cst_72 : f32 to vector<8x128xf32>
    %277 = arith.addf %276, %275 : vector<8x128xf32>
    %278 = arith.divf %276, %277 : vector<8x128xf32>
    %279 = vector.extract_strided_slice %261 {offsets = [0, 256], sizes = [8, 128], strides = [1, 1]} : vector<8x384xf32> to vector<8x128xf32>
    %280 = vector.extract_strided_slice %262 {offsets = [0, 256], sizes = [8, 128], strides = [1, 1]} : vector<8x384xf32> to vector<8x128xf32>
    %281 = arith.addf %280, %25 : vector<8x128xf32>
    %282 = arith.mulf %270, %281 : vector<8x128xf32>
    %283 = arith.addf %279, %282 : vector<8x128xf32>
    %284 = math.tanh %283 : vector<8x128xf32>
    %cst_73 = arith.constant 1.000000e+00 : f32
    %285 = vector.broadcast %cst_73 : f32 to vector<8x128xf32>
    %286 = arith.subf %285, %278 : vector<8x128xf32>
    %287 = arith.mulf %286, %284 : vector<8x128xf32>
    %288 = arith.mulf %278, %256 : vector<8x128xf32>
    %289 = arith.addf %287, %288 : vector<8x128xf32>
    %290 = arith.addf %257, %289 : vector<8x128xf32>
    %c8_i32_74 = arith.constant 8 : i32
    %c8_i32_75 = arith.constant 8 : i32
    %291 = arith.muli %c8_i32_74, %c8_i32_75 : i32
    %292 = tpu.assume_multiple %291, 8 : i32
    %293 = arith.index_cast %292 : i32 to index
    %c0_76 = arith.constant 0 : index
    %294 = vector.load %arg12[%293, %c0_76] : memref<72x384xf32, #tpu.memory_space<vmem>>, vector<8x384xf32>
    %cst_77 = arith.constant dense<0.000000e+00> : vector<8x384xf32>
    %295 = tpu.matmul %289, %22, %cst_77 {dimension_numbers = #tpu.dot_dimension_numbers<[1], [0], [0], [1], [0, 0, 1, 1], [], []>} : vector<8x128xf32>, vector<128x384xf32>, vector<8x384xf32> -> vector<8x384xf32>
    %296 = vector.extract_strided_slice %294 {offsets = [0, 0], sizes = [8, 128], strides = [1, 1]} : vector<8x384xf32> to vector<8x128xf32>
    %297 = vector.extract_strided_slice %295 {offsets = [0, 0], sizes = [8, 128], strides = [1, 1]} : vector<8x384xf32> to vector<8x128xf32>
    %298 = arith.addf %296, %297 : vector<8x128xf32>
    %299 = arith.negf %298 : vector<8x128xf32>
    %300 = math.exp %299 : vector<8x128xf32>
    %cst_78 = arith.constant 1.000000e+00 : f32
    %301 = vector.broadcast %cst_78 : f32 to vector<8x128xf32>
    %302 = arith.addf %301, %300 : vector<8x128xf32>
    %303 = arith.divf %301, %302 : vector<8x128xf32>
    %304 = vector.extract_strided_slice %294 {offsets = [0, 128], sizes = [8, 128], strides = [1, 1]} : vector<8x384xf32> to vector<8x128xf32>
    %305 = vector.extract_strided_slice %295 {offsets = [0, 128], sizes = [8, 128], strides = [1, 1]} : vector<8x384xf32> to vector<8x128xf32>
    %306 = arith.addf %304, %305 : vector<8x128xf32>
    %307 = arith.negf %306 : vector<8x128xf32>
    %308 = math.exp %307 : vector<8x128xf32>
    %cst_79 = arith.constant 1.000000e+00 : f32
    %309 = vector.broadcast %cst_79 : f32 to vector<8x128xf32>
    %310 = arith.addf %309, %308 : vector<8x128xf32>
    %311 = arith.divf %309, %310 : vector<8x128xf32>
    %312 = vector.extract_strided_slice %294 {offsets = [0, 256], sizes = [8, 128], strides = [1, 1]} : vector<8x384xf32> to vector<8x128xf32>
    %313 = vector.extract_strided_slice %295 {offsets = [0, 256], sizes = [8, 128], strides = [1, 1]} : vector<8x384xf32> to vector<8x128xf32>
    %314 = arith.addf %313, %25 : vector<8x128xf32>
    %315 = arith.mulf %303, %314 : vector<8x128xf32>
    %316 = arith.addf %312, %315 : vector<8x128xf32>
    %317 = math.tanh %316 : vector<8x128xf32>
    %cst_80 = arith.constant 1.000000e+00 : f32
    %318 = vector.broadcast %cst_80 : f32 to vector<8x128xf32>
    %319 = arith.subf %318, %311 : vector<8x128xf32>
    %320 = arith.mulf %319, %317 : vector<8x128xf32>
    %321 = arith.mulf %311, %289 : vector<8x128xf32>
    %322 = arith.addf %320, %321 : vector<8x128xf32>
    %323 = arith.addf %290, %322 : vector<8x128xf32>
    %c9_i32 = arith.constant 9 : i32
    %c0_81 = arith.constant 0 : index
    %c0_82 = arith.constant 0 : index
    %324 = vector.load %arg9[%c0_81, %c0_82] : memref<1x128xf32, #tpu.memory_space<vmem>>, vector<1x128xf32>
    %325 = vector.broadcast %324 : vector<1x128xf32> to vector<8x128xf32>
    %326 = arith.mulf %323, %325 : vector<8x128xf32>
    %cst_83 = arith.constant dense<0.000000e+00> : vector<8xf32>
    %327 = vector.multi_reduction <add>, %326, %cst_83 [1] : vector<8x128xf32> to vector<8xf32>
    %328 = vector.shape_cast %327 : vector<8xf32> to vector<8x1xf32>
    %c0_84 = arith.constant 0 : index
    %c0_85 = arith.constant 0 : index
    %329 = vector.load %arg10[%c0_84, %c0_85] : memref<1x1xf32, #tpu.memory_space<vmem>>, vector<1x1xf32>
    %330 = vector.broadcast %329 : vector<1x1xf32> to vector<8x1xf32>
    %331 = arith.addf %328, %330 : vector<8x1xf32>
    %332 = arith.negf %331 : vector<8x1xf32>
    %333 = math.exp %332 : vector<8x1xf32>
    %cst_86 = arith.constant 1.000000e+00 : f32
    %334 = vector.broadcast %cst_86 : f32 to vector<8x1xf32>
    %335 = arith.addf %334, %333 : vector<8x1xf32>
    %336 = arith.divf %334, %335 : vector<8x1xf32>
    %c0_87 = arith.constant 0 : index
    %c0_88 = arith.constant 0 : index
    %337 = vector.load %arg11[%c0_87, %c0_88] : memref<8x1xf32, #tpu.memory_space<vmem>>, vector<8x1xf32>
    tpu.vector_store %arg11[%c0_87, %c0_88], %336 {strides = array<i32>} : memref<8x1xf32, #tpu.memory_space<vmem>>, vector<8x1xf32>,
    return
  }
  func.func @transform_0(%arg0: i32) -> (i32, i32, i32) {
    %c0_i32 = arith.constant 0 : i32
    %c0_i32_0 = arith.constant 0 : i32
    %c0_i32_1 = arith.constant 0 : i32
    return %arg0, %c0_i32, %c0_i32_0 : i32, i32, i32
  }
  func.func @transform_1(%arg0: i32) -> (i32, i32, i32) {
    %c0_i32 = arith.constant 0 : i32
    %c0_i32_0 = arith.constant 0 : i32
    %c0_i32_1 = arith.constant 0 : i32
    return %c0_i32, %arg0, %c0_i32_0 : i32, i32, i32
  }
  func.func @transform_2(%arg0: i32) -> (i32, i32) {
    %c0_i32 = arith.constant 0 : i32
    %c0_i32_0 = arith.constant 0 : i32
    %c0_i32_1 = arith.constant 0 : i32
    return %c0_i32, %c0_i32_0 : i32, i32
  }
  func.func @transform_3(%arg0: i32) -> (i32, i32) {
    %c0_i32 = arith.constant 0 : i32
    %c0_i32_0 = arith.constant 0 : i32
    %c0_i32_1 = arith.constant 0 : i32
    return %c0_i32, %c0_i32_0 : i32, i32
  }
  func.func @transform_4(%arg0: i32) -> (i32, i32) {
    %c0_i32 = arith.constant 0 : i32
    %c0_i32_0 = arith.constant 0 : i32
    %c0_i32_1 = arith.constant 0 : i32
    return %c0_i32, %c0_i32_0 : i32, i32
  }
  func.func @transform_5(%arg0: i32) -> (i32, i32) {
    %c0_i32 = arith.constant 0 : i32
    %c0_i32_0 = arith.constant 0 : i32
    %c0_i32_1 = arith.constant 0 : i32
    return %c0_i32, %c0_i32_0 : i32, i32
  }
  func.func @transform_6(%arg0: i32) -> (i32, i32) {
    %c0_i32 = arith.constant 0 : i32
    %c0_i32_0 = arith.constant 0 : i32
    %c0_i32_1 = arith.constant 0 : i32
    return %c0_i32, %c0_i32_0 : i32, i32
  }
  func.func @transform_7(%arg0: i32) -> (i32, i32) {
    %c0_i32 = arith.constant 0 : i32
    %c0_i32_0 = arith.constant 0 : i32
    %c0_i32_1 = arith.constant 0 : i32
    return %c0_i32, %c0_i32_0 : i32, i32
  }
  func.func @transform_8(%arg0: i32) -> (i32, i32) {
    %c0_i32 = arith.constant 0 : i32
    %c0_i32_0 = arith.constant 0 : i32
    %c0_i32_1 = arith.constant 0 : i32
    return %c0_i32, %c0_i32_0 : i32, i32
  }
  func.func @transform_9(%arg0: i32) -> (i32, i32) {
    %c0_i32 = arith.constant 0 : i32
    %c0_i32_0 = arith.constant 0 : i32
    %c0_i32_1 = arith.constant 0 : i32
    return %c0_i32, %c0_i32_0 : i32, i32
  }
  func.func @transform_10(%arg0: i32) -> (i32, i32) {
    %c0_i32 = arith.constant 0 : i32
    %c0_i32_0 = arith.constant 0 : i32
    return %arg0, %c0_i32 : i32, i32
  }
}

</mosaic_0001>

<bundles_post_ra>
// kernel: tpu_custom_call.1
= control target key start
LH: loop header
LB: loop body
LE: loop exit
PB: predicated region body
PF: predicated region fallthrough
CT: control target
= control target key end

     0   :  { %s4465_s0 = inlined_call_operand.hbm [shape: f32[8,16,64], index: 0, kind: input, shape index: {}]   ;;  %s4466_s1 = inlined_call_operand.hbm [shape: f32[8,8,32], index: 1, kind: input, shape index: {}]   ;;  %s4467_s2 = inlined_call_operand.vmem [shape: f32[64,32], index: 2, kind: input, shape index: {}]   ;;  %s4468_s3 = inlined_call_operand.vmem [shape: f32[1,32], index: 3, kind: input, shape index: {}]   ;;  %s4469_s4 = inlined_call_operand.vmem [shape: f32[32,384], index: 4, kind: input, shape index: {}]   ;;  %s4470_s5 = inlined_call_operand.vmem [shape: f32[1,384], index: 5, kind: input, shape index: {}]   ;;  %s4471_s6 = inlined_call_operand.hbm [shape: f32[128,384], index: 6, kind: input, shape index: {}]   ;;  %s4472_s7 = inlined_call_operand.vmem [shape: f32[1,128], index: 7, kind: input, shape index: {}]   ;;  %s4473_s8 = inlined_call_operand.vmem [shape: f32[1,128], index: 8, kind: input, shape index: {}]   ;;  %s4474_s9 = inlined_call_operand.<no memory space> [shape: f32[1,1], index: 9, kind: input, shape index: {}]   ;;  %s4475_s10 = inlined_call_operand.vmem [shape: f32[8,1], index: 10, kind: output, shape index: {}]  }
   0x1   :  { %v15_v0 = vstv %s4474_s9 }
   0x2   :  { %16 = vst [vmem:[#allocation3] sm:$0x1] %v15_v0 }
   0x3   :  { %17 = vsyncpa [#allocation5], 0 }
   0x4   :  { %18 = vsyncpa [#allocation7], 0  ;;  %s3715_s15 = smov [#allocation6]   ;;  %s3716_s17 = smov [#allocation4]  }
   0x5   :  { %s36_s16 = sshll.u32 %s3715_s15, 4  ;;  %s24_s18 = sshll.u32 %s3716_s17, 4  ;;  %s37_s16 = int_to_ptr.vmem [resolvable:$true] %s36_s16  ;;  %s3783_s18 = int_to_ptr.vmem [resolvable:$true] %s24_s18 }
   0x6   :  { %s3645_s21 = scalar_lea.hbm %s4466_s1, 1024 }
   0x7   :  { %p3646_p0 = scmp.ne.s32.totalorder %s4466_s1, %s3645_s21  ;;  %p3649_p1 = scmp.lt.u32.totalorder %s3645_s21, %s4466_s1 }
   0x9   :  { %p3651_p2 = pnand %p3649_p1, %p3646_p0 }
   0xb   :  { %3654 = shalt.err (!%p3651_p2)
}
   0xc   :  { %s3655_s25 = scalar_lea.vmem %s37_s16, 1024  ;;  %p3660_p4 = scmp.lt.s32.totalorder %s37_s16, %s37_s16 }
   0xd   :  { %p3656_p3 = scmp.ne.s32.totalorder %s37_s16, %s3655_s25  ;;  %p3661_p5 = scmp.lt.s32.totalorder %s3655_s25, %s3655_s25 }
   0xf   :  { %p3662_p6 = por %p3661_p5, %p3660_p4 }
  0x11   :  { %p3663_p7 = pnand %p3662_p6, %p3656_p3 }
  0x13   :  { %3666 = shalt.err (!%p3663_p7)
}
  0x14   :  { %s3717_s26 = smov 128   ;;  %s3718_s27 = smov 8  }
  0x15   :  { %42 = dma.hbm_to_vmem [thread:$0]  %s4466_s1, 1024, %s37_s16, [#allocation7], %s3717_s26, %s3717_s26, %s3718_s27  }
  0x16   :  { %s3667_s12 = scalar_lea.hbm %s4465_s0, 2048 }
  0x17   :  { %p3668_p8 = scmp.ne.s32.totalorder %s4465_s0, %s3667_s12  ;;  %p3671_p9 = scmp.lt.u32.totalorder %s3667_s12, %s4465_s0 }
  0x19   :  { %p3673_p10 = pnand %p3671_p9, %p3668_p8 }
  0x1b   :  { %3676 = shalt.err (!%p3673_p10)
}
  0x1c   :  { %s3677_s19 = scalar_lea.vmem %s3783_s18, 2048  ;;  %p3682_p12 = scmp.lt.s32.totalorder %s3783_s18, %s3783_s18 }
  0x1d   :  { %p3678_p11 = scmp.ne.s32.totalorder %s3783_s18, %s3677_s19  ;;  %p3683_p13 = scmp.lt.s32.totalorder %s3677_s19, %s3677_s19 }
  0x1f   :  { %p3684_p0 = por %p3683_p13, %p3682_p12 }
  0x21   :  { %p3685_p1 = pnand %p3684_p0, %p3678_p11 }
  0x23   :  { %3688 = shalt.err (!%p3685_p1)
}
  0x24   :  { %30 = dma.hbm_to_vmem [thread:$0]  %s4465_s0, 2048, %s3783_s18, [#allocation5], %s3717_s26, %s3717_s26, %s3718_s27  }
  0x25   :  { %s3719_s20 = smov [#allocation8]   ;;  %s3689_s24 = scalar_lea.hbm %s4471_s6, 6144 }
  0x26   :  { %s56_s21 = sshll.u32 %s3719_s20, 4  ;;  %p3690_p2 = scmp.ne.s32.totalorder %s4471_s6, %s3689_s24  ;;  %s57_s21 = int_to_ptr.vmem [resolvable:$true] %s56_s21 }
  0x27   :  { %p3693_p3 = scmp.lt.u32.totalorder %s3689_s24, %s4471_s6 }
  0x29   :  { %p3695_p4 = pnand %p3693_p3, %p3690_p2 }
  0x2b   :  { %3698 = shalt.err (!%p3695_p4)
}
  0x2c   :  { %s3699_s30 = scalar_lea.vmem %s57_s21, 6144  ;;  %p3704_p6 = scmp.lt.s32.totalorder %s57_s21, %s57_s21 }
  0x2d   :  { %p3700_p5 = scmp.ne.s32.totalorder %s57_s21, %s3699_s30  ;;  %p3705_p7 = scmp.lt.s32.totalorder %s3699_s30, %s3699_s30 }
  0x2f   :  { %p3706_p8 = por %p3705_p7, %p3704_p6 }
  0x31   :  { %p3707_p9 = pnand %p3706_p8, %p3700_p5 }
  0x33   :  { %3710 = shalt.err (!%p3707_p9)
}
  0x34   :  { %s3720_s0 = smov 384   ;;  %s3721_s18 = smov 24  }
  0x35   :  { %62 = dma.hbm_to_vmem [thread:$0]  %s4471_s6, 6144, %s57_s21, [#allocation7], %s3720_s0, %s3720_s0, %s3721_s18  }
  0x36   :  { %3711 = dma.done.wait [#allocation5], 2048  }
  0x37   :  { %3712 = vsyncadd [#allocation5], 4294965248 }
  0x38   :  { %3713 = dma.done.wait [#allocation7], 7168  }
  0x39   :  { %3714 = vsyncadd [#allocation7], 4294960128  ;;  %v3722_v1 = vmov 0.0|0.0   ;;  %vm3723_vm0 = vmmov 0   ;;  %v3724_v2 = vmov 0.0   ;;  %v176_v3 = vld [vmem:[%s4467_s2] sm:$0xff] }
  0x3a   :  { %2959 = vmatprep.subr.bf16.mxu0 %v3722_v1  ;;  %2610 = vmatprep.mubr.msk.f32.mxu0 %vm3723_vm0, %v3724_v2  ;;  %v177_v4 = vld [vmem:[%s4467_s2 + $0x8] sm:$0xff]  ;;  %v178_v5 = vld [vmem:[%s4467_s2 + $0x10] sm:$0xff]  ;;  %vm94_vm1 = vcmask 523264   ;;  %v179_v7 = vld [vmem:[%s4467_s2 + $0x18] sm:$0xff]  ;;  %vm199_vm2 = vcmask 1041409   ;;  %vm201_vm3 = vcmask 1042434  }
  0x3b   :  { %382 = vmatprep.mubr.f32.mxu1 %v3724_v2  ;;  %v2960_v6 = vpack.c.bf16 %v177_v4, %v176_v3  ;;  %v180_v8 = vld [vmem:[%s4467_s2 + $0x20] sm:$0xff]  ;;  %v181_v9 = vld [vmem:[%s4467_s2 + $0x28] sm:$0xff]  ;;  %v3851_v10 = vld [vmem:[%s4467_s2 + $0x30] sm:$0xff]  ;;  %v2963_v13 = vpack.c.bf16 %v179_v7, %v178_v5  ;;  %vm203_vm4 = vcmask 1043459   ;;  %vm205_vm5 = vcmask 1044484  }
  0x3c   :  { %v3856_v11 = vld [vmem:[%s4467_s2 + $0x38] sm:$0xff]  ;;  %v78_v12 = vld [vmem:[#allocation4] sm:$0xff]  ;;  %v2966_v14 = vpack.c.bf16 %v181_v9, %v180_v8  ;;  %v79_v15 = vld [vmem:[#allocation4 + $0x8] sm:$0xff]  ;;  %vm207_vm6 = vcmask 1045509   ;;  %vm209_vm7 = vcmask 1046534   ;;  %vm211_vm8 = vcmask 1047559  }
  0x3d   :  { %2961 = vmatpush3.bf16.msra.mxu0 %v2960_v6  ;;  %v80_v16 = vld [vmem:[#allocation4 + $0x10] sm:$0xff]  ;;  %v81_v17 = vld [vmem:[#allocation4 + $0x18] sm:$0xff]  ;;  %v95_v18 = vsel %vm94_vm1, %v78_v12, 0.0  ;;  %v2969_v19 = vpack.c.bf16 %v3856_v11, %v3851_v10  ;;  %v82_v20 = vld [vmem:[#allocation4 + $0x20] sm:$0xff]  ;;  %v96_v23 = vsel %vm94_vm1, %v79_v15, 0.0  ;;  %vm314_vm9 = vcmask 261120  }
  0x3e   :  { %2962 = vmatprep.subr.bf16.mxu0 %v3722_v1  ;;  %v83_v21 = vld [vmem:[#allocation4 + $0x28] sm:$0xff]  ;;  %v84_v22 = vld [vmem:[#allocation4 + $0x30] sm:$0xff]  ;;  %v104_v24 = vsel %vm94_vm1, %v80_v16, 0.0  ;;  %v105_v25 = vsel %vm94_vm1, %v81_v17, 0.0  ;;  %v85_v26 = vld [vmem:[#allocation4 + $0x38] sm:$0xff]  ;;  %v97_v29 = vadd.f32 %v96_v23, %v95_v18  ;;  %v113_v31 = vsel %vm94_vm1, %v82_v20, 0.0 }
  0x3f   :  { %v86_v27 = vld [vmem:[#allocation4 + $0x40] sm:$0xff]  ;;  %v87_v28 = vld [vmem:[#allocation4 + $0x48] sm:$0xff]  ;;  %v106_v30 = vadd.f32 %v105_v25, %v104_v24  ;;  %v114_v32 = vsel %vm94_vm1, %v83_v21, 0.0  ;;  %v88_v33 = vld [vmem:[#allocation4 + $0x50] sm:$0xff]  ;;  %v122_v36 = vsel %vm94_vm1, %v84_v22, 0.0  ;;  %v123_v37 = vsel %vm94_vm1, %v85_v26, 0.0 }
  0x40   :  { %v89_v34 = vld [vmem:[#allocation4 + $0x58] sm:$0xff]  ;;  %v115_v35 = vadd.f32 %v114_v32, %v113_v31  ;;  %v131_v38 = vsel %vm94_vm1, %v86_v27, 0.0  ;;  %v90_v39 = vld [vmem:[#allocation4 + $0x60] sm:$0xff]  ;;  %v91_v40 = vld [vmem:[#allocation4 + $0x68] sm:$0xff]  ;;  %v98_v41 = vrot.slane %v97_v29, 4  ;;  %v124_v43 = vadd.f32 %v123_v37, %v122_v36 }
  0x41   :  { %2964 = vmatpush3.bf16.msra.mxu0 %v2963_v13  ;;  %v107_v42 = vrot.slane %v106_v30, 4  ;;  %v132_v44 = vsel %vm94_vm1, %v87_v28, 0.0  ;;  %v140_v47 = vsel %vm94_vm1, %v88_v33, 0.0  ;;  %v141_v48 = vsel %vm94_vm1, %v89_v34, 0.0  ;;  %v92_v49 = vld [vmem:[#allocation4 + $0x70] sm:$0xff]  ;;  %v93_v58 = vld [vmem:[#allocation4 + $0x78] sm:$0xff] }
  0x42   :  { %2965 = vmatprep.subr.bf16.mxu0 %v3722_v1  ;;  %v116_v45 = vrot.slane %v115_v35, 4  ;;  %v133_v46 = vadd.f32 %v132_v44, %v131_v38  ;;  %v99_v50 = vadd.f32 %v98_v41, %v97_v29  ;;  %v125_v52 = vrot.slane %v124_v43, 4  ;;  %v287_v10 = vld [vmem:[%s4469_s4 + $0x8] sm:$0xff]  ;;  %v290_v11 = vld [vmem:[%s4469_s4 + $0x20] sm:$0xff]  ;;  %v293_v41 = vld [vmem:[%s4469_s4 + $0x38] sm:$0xff] }
  0x43   :  { %v108_v51 = vadd.f32 %v107_v42, %v106_v30  ;;  %v142_v53 = vadd.f32 %v141_v48, %v140_v47  ;;  %v149_v56 = vsel %vm94_vm1, %v90_v39, 0.0  ;;  %v150_v57 = vsel %vm94_vm1, %v91_v40, 0.0  ;;  %v289_v40 = vld [vmem:[%s4469_s4 + $0x18] sm:$0xff]  ;;  %v296_v42 = vld [vmem:[%s4469_s4 + $0x50] sm:$0xff] }
  0x44   :  { %v117_v54 = vadd.f32 %v116_v45, %v115_v35  ;;  %v134_v55 = vrot.slane %v133_v46, 4  ;;  %v100_v59 = vrot.slane %v99_v50, 2  ;;  %v126_v61 = vadd.f32 %v125_v52, %v124_v43  ;;  %v286_v35 = vld [vmem:[%s4469_s4] sm:$0xff]  ;;  %v295_v52 = vld [vmem:[%s4469_s4 + $0x48] sm:$0xff] }
  0x45   :  { %2967 = vmatpush3.bf16.msra.mxu0 %v2966_v14  ;;  %v109_v60 = vrot.slane %v108_v51, 2  ;;  %v143_v62 = vrot.slane %v142_v53, 4  ;;  %v151_v3 = vadd.f32 %v150_v57, %v149_v56  ;;  %v158_v4 = vsel %vm94_vm1, %v92_v49, 0.0 }
  0x46   :  { %2968 = vmatprep.subr.bf16.mxu0 %v3722_v1  ;;  %v118_v63 = vrot.slane %v117_v54, 2  ;;  %v135_v0 = vadd.f32 %v134_v55, %v133_v46  ;;  %v101_v5 = vadd.f32 %v100_v59, %v99_v50  ;;  %v127_v7 = vrot.slane %v126_v61, 2 }
  0x47   :  { %v110_v6 = vadd.f32 %v109_v60, %v108_v51  ;;  %v144_v8 = vadd.f32 %v143_v62, %v142_v53  ;;  %v152_v13 = vrot.slane %v151_v3, 4  ;;  %v159_v14 = vsel %vm94_vm1, %v93_v58, 0.0  ;;  %v292_v51 = vld [vmem:[%s4469_s4 + $0x30] sm:$0xff] }
  0x48   :  { %v119_v9 = vadd.f32 %v118_v63, %v117_v54  ;;  %v136_v12 = vrot.slane %v135_v0, 2  ;;  %v102_v15 = vrot.slane %v101_v5, 1  ;;  %v128_v17 = vadd.f32 %v127_v7, %v126_v61  ;;  %v3920_v7 = vld [vmem:[#allocation6 + $0x8] sm:$0xff] }
  0x49   :  { %2970 = vmatpush3.bf16.msra.mxu0 %v2969_v19  ;;  %v111_v16 = vrot.slane %v110_v6, 1  ;;  %v145_v18 = vrot.slane %v144_v8, 2  ;;  %v153_v22 = vadd.f32 %v152_v13, %v151_v3  ;;  %v160_v23 = vadd.f32 %v159_v14, %v158_v4  ;;  %v753_v13 = vld [vmem:[#allocation8 + $0x28] sm:$0xff] }
  0x4a   :  { %v120_v20 = vrot.slane %v119_v9, 1  ;;  %v137_v21 = vadd.f32 %v136_v12, %v135_v0  ;;  %v103_v24 = vadd.f32 %v102_v15, %v101_v5  ;;  %v129_v26 = vrot.slane %v128_v17, 1  ;;  %v750_v12 = vld [vmem:[#allocation8 + $0x10] sm:$0xff]  ;;  %v3937_v15 = vld [vmem:[#allocation6 + $0x20] sm:$0xff] }
  0x4b   :  { %v112_v25 = vadd.f32 %v111_v16, %v110_v6  ;;  %v146_v27 = vadd.f32 %v145_v18, %v144_v8  ;;  %v154_v30 = vrot.slane %v153_v22, 2  ;;  %v161_v31 = vrot.slane %v160_v23, 4  ;;  %v3915_v6 = vld [vmem:[#allocation6] sm:$0xff]  ;;  %v3925_v8 = vld [vmem:[#allocation6 + $0x10] sm:$0xff] }
  0x4c   :  { %v121_v28 = vadd.f32 %v120_v20, %v119_v9  ;;  %v138_v29 = vrot.slane %v137_v21, 1  ;;  %v130_v19 = vadd.f32 %v129_v26, %v128_v17  ;;  %v168_v33 = vmul.f32 0.0625, %v103_v24  ;;  %v3930_v9 = vld [vmem:[#allocation6 + $0x18] sm:$0xff]  ;;  %v756_v16 = vld [vmem:[#allocation8 + $0x40] sm:$0xff]  ;;  %v3946_v20 = vld [vmem:[#allocation6 + $0x28] sm:$0xff] }
  0x4d   :  { %v147_v32 = vrot.slane %v146_v27, 1  ;;  %v169_v34 = vmul.f32 0.0625, %v112_v25  ;;  %v155_v37 = vadd.f32 %v154_v30, %v153_v22  ;;  %v162_v38 = vadd.f32 %v161_v31, %v160_v23  ;;  %v759_v17 = vld [vmem:[#allocation8 + $0x58] sm:$0xff]  ;;  %v765_v22 = vld [vmem:[#allocation8 + $0x88] sm:$0xff]  ;;  %v768_v24 = vld [vmem:[#allocation8 + $0xa0] sm:$0xff] }
  0x4e   :  { %v139_v36 = vadd.f32 %v138_v29, %v137_v21  ;;  %v170_v39 = vmul.f32 0.0625, %v121_v28  ;;  %v171_v44 = vmul.f32 0.0625, %v130_v19  ;;  %v2971_v46 = vpack.c.bf16 %v290_v11, %v287_v10  ;;  %v762_v21 = vld [vmem:[#allocation8 + $0x70] sm:$0xff]  ;;  %v771_v25 = vld [vmem:[#allocation8 + $0xb8] sm:$0xff]  ;;  %v777_v29 = vld [vmem:[#allocation8 + $0xe8] sm:$0xff] }
  0x4f   :  { %v148_v43 = vadd.f32 %v147_v32, %v146_v27  ;;  %v200_v45 = vsel %vm199_vm2, %v169_v34, %v168_v33  ;;  %v156_v47 = vrot.slane %v155_v37, 1  ;;  %v163_v48 = vrot.slane %v162_v38, 2  ;;  %v3955_v26 = vld [vmem:[#allocation6 + $0x30] sm:$0xff]  ;;  %v3964_v30 = vld [vmem:[#allocation6 + $0x38] sm:$0xff]  ;;  %v780_v10 = vld [vmem:[#allocation8 + $0x100] sm:$0xff] }
  0x50   :  { %v172_v49 = vmul.f32 0.0625, %v139_v36  ;;  %v202_v50 = vsel %vm201_vm3, %v170_v39, %v200_v45  ;;  %2972 = vmatprep.subr.bf16.mxu1 %v2971_v46  ;;  %v2973_v55 = vpack.c.bf16 %v289_v40, %v286_v35  ;;  %v2975_v56 = vpack.c.bf16 %v296_v42, %v293_v41  ;;  %2986 = vmatprep.subr.bf16.mxu0 %v2971_v46  ;;  %v774_v28 = vld [vmem:[#allocation8 + $0xd0] sm:$0xff]  ;;  %v783_v11 = vld [vmem:[#allocation8 + $0x118] sm:$0xff]  ;;  %v789_v33 = vld [vmem:[#allocation8 + $0x148] sm:$0xff] }
  0x51   :  { %v173_v53 = vmul.f32 0.0625, %v148_v43  ;;  %v204_v54 = vsel %vm203_vm4, %v171_v44, %v202_v50  ;;  %v157_v57 = vadd.f32 %v156_v47, %v155_v37  ;;  %v164_v58 = vadd.f32 %v163_v48, %v162_v38  ;;  %v786_v32 = vld [vmem:[#allocation8 + $0x130] sm:$0xff]  ;;  %v792_v35 = vld [vmem:[#allocation8 + $0x160] sm:$0xff]  ;;  %v795_v36 = vld [vmem:[#allocation8 + $0x178] sm:$0xff] }
  0x52   :  { %v206_v59 = vsel %vm205_vm5, %v172_v49, %v204_v54  ;;  %2974 = vmatpush1.bf16.msra.mxu1 %v2973_v55  ;;  %v2977_v60 = vpack.c.bf16 %v295_v52, %v292_v51  ;;  %v3935_v14 = vpack.c.bf16 %v753_v13, %v750_v12  ;;  %v3943_v18 = vpack.c.bf16 %v759_v17, %v756_v16  ;;  %v749_v37 = vld [vmem:[#allocation8 + $0x8] sm:$0xff]  ;;  %v752_v38 = vld [vmem:[#allocation8 + $0x20] sm:$0xff]  ;;  %v751_v42 = vld [vmem:[#allocation8 + $0x18] sm:$0xff] }
  0x53   :  { %v165_v61 = vrot.slane %v164_v58, 1  ;;  %v174_v62 = vmul.f32 0.0625, %v157_v57  ;;  %v208_v63 = vsel %vm207_vm6, %v173_v53, %v206_v59  ;;  %2976 = vmatprep.subr.bf16.mxu1 %v2975_v56  ;;  %v3952_v23 = vpack.c.bf16 %v765_v22, %v762_v21  ;;  %v748_v41 = vld [vmem:[#allocation8] sm:$0xff]  ;;  %v755_v43 = vld [vmem:[#allocation8 + $0x38] sm:$0xff]  ;;  %v758_v44 = vld [vmem:[#allocation8 + $0x50] sm:$0xff] }
  0x54   :  { %v3958_v27 = vpack.c.bf16 %v771_v25, %v768_v24  ;;  %v3967_v31 = vpack.c.bf16 %v777_v29, %v774_v28  ;;  %v3975_v19 = vpack.c.bf16 %v783_v11, %v780_v10  ;;  %v3979_v34 = vpack.c.bf16 %v789_v33, %v786_v32  ;;  %v754_v47 = vld [vmem:[#allocation8 + $0x30] sm:$0xff]  ;;  %v757_v48 = vld [vmem:[#allocation8 + $0x48] sm:$0xff]  ;;  %v764_v50 = vld [vmem:[#allocation8 + $0x80] sm:$0xff] }
  0x55   :  { %v166_v0 = vadd.f32 %v165_v61, %v164_v58  ;;  %v210_v3 = vsel %vm209_vm7, %v174_v62, %v208_v63  ;;  %v3983_v39 = vpack.c.bf16 %v795_v36, %v792_v35  ;;  %v3986_v40 = vpack.c.bf16 %v752_v38, %v749_v37  ;;  %v761_v49 = vld [vmem:[#allocation8 + $0x68] sm:$0xff]  ;;  %v760_v53 = vld [vmem:[#allocation8 + $0x60] sm:$0xff]  ;;  %v763_v54 = vld [vmem:[#allocation8 + $0x78] sm:$0xff] }
  0x56   :  { %2978 = vmatpush1.bf16.msra.mxu1 %v2977_v60  ;;  %v3990_v45 = vpack.c.bf16 %v751_v42, %v748_v41  ;;  %v3992_v46 = vpack.c.bf16 %v758_v44, %v755_v43  ;;  %v3998_v51 = vpack.c.bf16 %v757_v48, %v754_v47  ;;  %v4000_v52 = vpack.c.bf16 %v764_v50, %v761_v49  ;;  %v766_v59 = vld [vmem:[#allocation8 + $0x90] sm:$0xff]  ;;  %v773_v61 = vld [vmem:[#allocation8 + $0xc8] sm:$0xff]  ;;  %v776_v62 = vld [vmem:[#allocation8 + $0xe0] sm:$0xff] }
  0x57   :  { %v175_v4 = vmul.f32 0.0625, %v166_v0  ;;  %2979 = vmatprep.subr.bf16.mxu1 %v3722_v1  ;;  %v4004_v57 = vpack.c.bf16 %v763_v54, %v760_v53  ;;  %v4012_v0 = vpack.c.bf16 %v776_v62, %v773_v61  ;;  %v782_v12 = vld [vmem:[#allocation8 + $0x110] sm:$0xff]  ;;  %v781_v21 = vld [vmem:[#allocation8 + $0x108] sm:$0xff]  ;;  %v788_v24 = vld [vmem:[#allocation8 + $0x140] sm:$0xff]  ;;  %vm2357_vm10 = vcmask 7168  }
  0x58   :  { %v778_v17 = vld [vmem:[#allocation8 + $0xf0] sm:$0xff]  ;;  %v785_v22 = vld [vmem:[#allocation8 + $0x128] sm:$0xff]  ;;  %v784_v29 = vld [vmem:[#allocation8 + $0x120] sm:$0xff] }
  0x59   :  { %v212_v5 = vsel %vm211_vm8, %v175_v4, %v210_v3  ;;  %v772_v3 = vld [vmem:[#allocation8 + $0xc0] sm:$0xff]  ;;  %v775_v4 = vld [vmem:[#allocation8 + $0xd8] sm:$0xff]  ;;  %v4022_v25 = vpack.c.bf16 %v781_v21, %v778_v17  ;;  %v4024_v28 = vpack.c.bf16 %v788_v24, %v785_v22  ;;  %v794_v32 = vld [vmem:[#allocation8 + $0x170] sm:$0xff] }
  0x5a   :  { %2611 = vmatmul.mubr.msk.f32.vlgmr.msra.gmra.mrb[0].mxu0 %vm94_vm1, %v212_v5  ;;  %v779_v5 = vld [vmem:[#allocation8 + $0xf8] sm:$0xff]  ;;  %v4016_v13 = vpack.c.bf16 %v775_v4, %v772_v3  ;;  %v790_v36 = vld [vmem:[#allocation8 + $0x150] sm:$0xff]  ;;  %v793_v37 = vld [vmem:[#allocation8 + $0x168] sm:$0xff] }
  0x5b   :  { %2988 = vmatpush1.bf16.msra.mxu0 %v2973_v55  ;;  %570 = vmatprep.mubr.f32.mxu0 %v3724_v2  ;;  %v767_v55 = vld [vmem:[#allocation8 + $0x98] sm:$0xff]  ;;  %v4018_v16 = vpack.c.bf16 %v782_v12, %v779_v5  ;;  %v4034_v38 = vpack.c.bf16 %v793_v37, %v790_v36  ;;  %v288_v41 = vld [vmem:[%s4469_s4 + $0x10] sm:$0xff]  ;;  %v291_v42 = vld [vmem:[%s4469_s4 + $0x28] sm:$0xff] }
  0x5c   :  { %2990 = vmatprep.subr.bf16.mxu0 %v2975_v56  ;;  %v770_v56 = vld [vmem:[#allocation8 + $0xb0] sm:$0xff]  ;;  %v787_v10 = vld [vmem:[#allocation8 + $0x138] sm:$0xff]  ;;  %v2980_v47 = vpack.c.bf16 %v291_v42, %v288_v41 }
  0x5d   :  { %v4006_v58 = vpack.c.bf16 %v770_v56, %v767_v55  ;;  %v791_v11 = vld [vmem:[#allocation8 + $0x158] sm:$0xff]  ;;  %v4028_v33 = vpack.c.bf16 %v787_v10, %v784_v29 }
  0x5e   :  { %v4030_v35 = vpack.c.bf16 %v794_v32, %v791_v11  ;;  %v2373_v43 = vld [vmem:[%s4468_s3] ss:$0 sm:$0xff]  ;;  %v297_v53 = vld [vmem:[%s4469_s4 + $0x58] sm:$0xff] }
  0x5f   :  { %2992 = vmatpush1.bf16.msra.mxu0 %v2977_v60  ;;  %v769_v60 = vld [vmem:[#allocation8 + $0xa8] sm:$0xff]  ;;  %v294_v50 = vld [vmem:[%s4469_s4 + $0x40] sm:$0xff] }
  0x60   :  { %3033 = vmatprep.subr.bf16.mxu0 %v3722_v1  ;;  %v4010_v63 = vpack.c.bf16 %v769_v60, %v766_v59  ;;  %v2983_v54 = vpack.c.bf16 %v297_v53, %v294_v50 }
  0x62   :  { %2377 = vmatmul.mubr.msk.f32.vlgmr.msra.gmra.mrb[2].mxu0 %vm314_vm9, %v3915_v6 }
  0x63   :  { %576 = vmatprep.mubr.f32.mxu0 %v3724_v2  ;;  %3035 = vmatpush3.bf16.msra.mxu0 %v3935_v14 }
  0x64   :  { %3036 = vmatprep.subr.bf16.mxu0 %v3722_v1 }
  0x66   :  { %2378 = vmatmul.mubr.msk.f32.gmra.mrb[4].mxu0 %vm314_vm9, %v3920_v7 }
  0x67   :  { %582 = vmatprep.mubr.f32.mxu0 %v3724_v2  ;;  %3038 = vmatpush3.bf16.msra.mxu0 %v3943_v18 }
  0x68   :  { %3039 = vmatprep.subr.bf16.mxu0 %v3722_v1 }
  0x6a   :  { %2379 = vmatmul.mubr.msk.f32.gmra.mrb[6].mxu0 %vm314_vm9, %v3925_v8 }
  0x6b   :  { %588 = vmatprep.mubr.f32.mxu0 %v3724_v2  ;;  %3041 = vmatpush3.bf16.msra.mxu0 %v3952_v23 }
  0x6c   :  { %3042 = vmatprep.subr.bf16.mxu0 %v3722_v1 }
  0x6e   :  { %2380 = vmatmul.mubr.msk.f32.gmra.mrb[8].mxu0 %vm314_vm9, %v3930_v9 }
  0x6f   :  { %594 = vmatprep.mubr.f32.mxu0 %v3724_v2  ;;  %3044 = vmatpush3.bf16.msra.mxu0 %v3958_v27 }
  0x70   :  { %3045 = vmatprep.subr.bf16.mxu0 %v3722_v1 }
  0x72   :  { %2381 = vmatmul.mubr.msk.f32.gmra.mrb[10].mxu0 %vm314_vm9, %v3937_v15 }
  0x73   :  { %600 = vmatprep.mubr.f32.mxu0 %v3724_v2  ;;  %3047 = vmatpush3.bf16.msra.mxu0 %v3967_v31 }
  0x74   :  { %3048 = vmatprep.subr.bf16.mxu0 %v3722_v1 }
  0x76   :  { %2382 = vmatmul.mubr.msk.f32.gmra.mrb[12].mxu0 %vm314_vm9, %v3946_v20 }
  0x77   :  { %606 = vmatprep.mubr.f32.mxu0 %v3724_v2  ;;  %3050 = vmatpush3.bf16.msra.mxu0 %v3975_v19 }
  0x78   :  { %3051 = vmatprep.subr.bf16.mxu0 %v3722_v1 }
  0x7a   :  { %2383 = vmatmul.mubr.msk.f32.gmra.mrb[14].mxu0 %vm314_vm9, %v3955_v26 }
  0x7b   :  { %612 = vmatprep.mubr.f32.mxu0 %v3724_v2  ;;  %3053 = vmatpush3.bf16.msra.mxu0 %v3979_v34 }
  0x7c   :  { %3054 = vmatprep.subr.bf16.mxu0 %v3722_v1 }
  0x7e   :  { %2384 = vmatmul.mubr.msk.f32.gmra.mrb[16].mxu0 %vm314_vm9, %v3964_v30 }
  0x7f   :  { %2676 = vmatprep.mubr.msk.f32.mxu0 %vm3723_vm0, %v3724_v2  ;;  %3056 = vmatpush3.bf16.msra.mxu0 %v3983_v39 }
  0x80   :  { %3058 = vmatprep.subr.bf16.mxu0 %v3986_v40 }
  0x82   :  { %2677 = vmatmul.mubr.f32.vlgmr.msra.gmra.mrb[18].mxu0 %v3724_v2 }
  0x83   :  { %3060 = vmatpush1.bf16.msra.mxu0 %v3990_v45  ;;  %1043 = vmatprep.mubr.f32.mxu0 %v3724_v2 }
  0x84   :  { %3062 = vmatprep.subr.bf16.mxu0 %v3992_v46 }
  0x87   :  { %3064 = vmatpush1.bf16.msra.mxu0 %v3998_v51 }
  0x88   :  { %3066 = vmatprep.subr.bf16.mxu0 %v4000_v52 }
  0x8b   :  { %3068 = vmatpush1.bf16.msra.mxu0 %v4004_v57 }
  0x8c   :  { %3070 = vmatprep.subr.bf16.mxu0 %v4006_v58 }
  0x8f   :  { %3072 = vmatpush1.bf16.msra.mxu0 %v4010_v63 }
  0x90   :  { %3074 = vmatprep.subr.bf16.mxu0 %v4012_v0 }
  0x93   :  { %3076 = vmatpush1.bf16.msra.mxu0 %v4016_v13 }
  0x94   :  { %3078 = vmatprep.subr.bf16.mxu0 %v4018_v16 }
  0x97   :  { %3080 = vmatpush1.bf16.msra.mxu0 %v4022_v25 }
  0x98   :  { %3082 = vmatprep.subr.bf16.mxu0 %v4024_v28 }
  0x9b   :  { %3084 = vmatpush1.bf16.msra.mxu0 %v4028_v33 }
  0x9c   :  { %3086 = vmatprep.subr.bf16.mxu0 %v4030_v35 }
  0x9f   :  { %3088 = vmatpush1.bf16.msra.mxu0 %v4034_v38 }
  0xa0   :  { %3114 = vmatprep.subr.bf16.mxu0 %v3986_v40 }
 0x12d   :  { %v281_v44 = vpop.f32.mrb[0].mxu0 }
 0x12e   :  { %v282_v48 = vadd.f32 %v2373_v43, %v281_v44  ;;  %v2612_v49 = vpop.f32.mrb[1].mxu0 }
 0x130   :  { %2375 = vmatmul.mubr.msk.f32.vlgmr.msra.gmra.mrb[0].mxu1 %vm314_vm9, %v282_v48 }
 0x131   :  { %2981 = vmatpush3.bf16.msra.mxu1 %v2980_v47  ;;  %2621 = vmatprep.mubr.msk.f32.mxu1 %vm3723_vm0, %v3724_v2 }
 0x132   :  { %2982 = vmatprep.subr.bf16.mxu1 %v3722_v1 }
 0x135   :  { %2984 = vmatpush3.bf16.msra.mxu1 %v2983_v54 }
 0x136   :  { %2994 = vmatprep.subr.bf16.mxu1 %v2980_v47 }
 0x138   :  { %2622 = vmatmul.mubr.msk.f32.vlgmr.msra.gmra.mrb[2].mxu1 %vm314_vm9, %v282_v48 }
 0x139   :  { %2996 = vmatpush3.bf16.msra.mxu1 %v2980_v47  ;;  %2632 = vmatprep.mubr.msk.f32.mxu1 %vm314_vm9, %v3915_v6 }
 0x13a   :  { %2998 = vmatprep.subr.bf16.mxu1 %v2983_v54 }
 0x13d   :  { %3000 = vmatpush3.bf16.msra.mxu1 %v2983_v54 }
 0x13e   :  { %3002 = vmatprep.subr.bf16.mxu1 %v3986_v40 }
 0x140   :  { %2633 = vmatmul.mubr.msk.f32.vlgmr.msra.gmra.mrb[4].mxu1 %vm314_vm9, %v3920_v7 }
 0x141   :  { %3004 = vmatpush1.bf16.msra.mxu1 %v3990_v45  ;;  %2635 = vmatprep.mubr.msk.f32.mxu1 %vm314_vm9, %v3925_v8  ;;  %v299_v8 = vlaneseq }
 0x142   :  { %3006 = vmatprep.subr.bf16.mxu1 %v3992_v46 }
 0x144   :  { %2636 = vmatmul.mubr.msk.f32.gmra.mrb[6].mxu1 %vm314_vm9, %v3930_v9  ;;  %v300_v9 = vshrl.u32 %v299_v8, 7 }
 0x145   :  { %3008 = vmatpush1.bf16.msra.mxu1 %v3998_v51  ;;  %2638 = vmatprep.mubr.msk.f32.mxu1 %vm314_vm9, %v3937_v15 }
 0x146   :  { %3010 = vmatprep.subr.bf16.mxu1 %v4000_v52  ;;  %v301_v32 = vsub.s32 0, %v300_v9  ;;  %v305_v36 = vsub.s32 1, %v300_v9 }
 0x148   :  { %2639 = vmatmul.mubr.msk.f32.gmra.mrb[8].mxu1 %vm314_vm9, %v3946_v20 }
 0x149   :  { %3012 = vmatpush1.bf16.msra.mxu1 %v4004_v57  ;;  %2641 = vmatprep.mubr.msk.f32.mxu1 %vm314_vm9, %v3955_v26  ;;  %v309_v26 = vsub.s32 2, %v300_v9 }
 0x14a   :  { %3014 = vmatprep.subr.bf16.mxu1 %v4006_v58 }
 0x14c   :  { %2642 = vmatmul.mubr.msk.f32.gmra.mrb[10].mxu1 %vm314_vm9, %v3964_v30  ;;  %v285_v30 = vld [vmem:[%s4470_s5] sm:$0x7] }
 0x14d   :  { %3016 = vmatpush1.bf16.msra.mxu1 %v4010_v63  ;;  %873 = vmatprep.mubr.f32.mxu1 %v3724_v2  ;;  %v310_v55 = vrot.slane %v285_v30, %v309_v26  ;;  %v4130_v37 = vrot.slane %v285_v30, %v301_v32  ;;  %v4132_v42 = vrot.slane %v285_v30, %v305_v36 }
 0x14e   :  { %3018 = vmatprep.subr.bf16.mxu1 %v4012_v0 }
 0x151   :  { %3020 = vmatpush1.bf16.msra.mxu1 %v4016_v13 }
 0x152   :  { %3022 = vmatprep.subr.bf16.mxu1 %v4018_v16 }
 0x155   :  { %3024 = vmatpush1.bf16.msra.mxu1 %v4022_v25  ;;  %v946_v6 = vpop.f32.mrb[18].mxu0 }
 0x156   :  { %3026 = vmatprep.subr.bf16.mxu1 %v4024_v28  ;;  %v2678_v7 = vpop.f32.mrb[19].mxu0 }
 0x157   :  { %v4139_v7 = vld [vmem:[%s4472_s7] ss:$0 sm:$0xff] }
 0x158   :  { %v964_v9 = vadd.f32 %v4139_v7, %v946_v6 }
 0x159   :  { %3028 = vmatpush1.bf16.msra.mxu1 %v4028_v33 }
 0x15a   :  { %3030 = vmatprep.subr.bf16.mxu1 %v4030_v35 }
 0x15d   :  { %3032 = vmatpush1.bf16.msra.mxu1 %v4034_v38 }
 0x15e   :  { %3089 = vmatprep.subr.bf16.mxu1 %v3722_v1 }
 0x160   :  { %874 = vmatmul.mubr.f32.vlgmr.msra.gmra.mrb[0].mxu1 %v3724_v2 }
 0x161   :  { %3091 = vmatpush3.bf16.msra.mxu1 %v3935_v14  ;;  %2711 = vmatprep.mubr.msk.f32.mxu1 %vm3723_vm0, %v3724_v2 }
 0x162   :  { %3092 = vmatprep.subr.bf16.mxu1 %v3722_v1 }
 0x165   :  { %3094 = vmatpush3.bf16.msra.mxu1 %v3943_v18 }
 0x166   :  { %3095 = vmatprep.subr.bf16.mxu1 %v3722_v1 }
 0x169   :  { %3097 = vmatpush3.bf16.msra.mxu1 %v3952_v23 }
 0x16a   :  { %3098 = vmatprep.subr.bf16.mxu1 %v3722_v1 }
 0x16d   :  { %3100 = vmatpush3.bf16.msra.mxu1 %v3958_v27 }
 0x16e   :  { %3101 = vmatprep.subr.bf16.mxu1 %v3722_v1 }
 0x171   :  { %3103 = vmatpush3.bf16.msra.mxu1 %v3967_v31 }
 0x172   :  { %3104 = vmatprep.subr.bf16.mxu1 %v3722_v1 }
 0x175   :  { %3106 = vmatpush3.bf16.msra.mxu1 %v3975_v19 }
 0x176   :  { %3107 = vmatprep.subr.bf16.mxu1 %v3722_v1 }
 0x179   :  { %3109 = vmatpush3.bf16.msra.mxu1 %v3979_v34 }
 0x17a   :  { %3110 = vmatprep.subr.bf16.mxu1 %v3722_v1 }
 0x17d   :  { %3112 = vmatpush3.bf16.msra.mxu1 %v3983_v39 }
 0x17e   :  { %3145 = vmatprep.subr.bf16.mxu1 %v3722_v1 }
 0x20b   :  { %v455_v15 = vpop.f32.mrb[2].mxu1 }
 0x20c   :  { %v2623_v20 = vpop.f32.mrb[3].mxu1  ;;  %v456_v26 = vadd.f32 %v455_v15, %v310_v55 }
 0x213   :  { %v2634_v56 = vpop.f32.mrb[4].mxu1 }
 0x214   :  { %v4114_v59 = vadd.f32 %v2634_v56, %v310_v55  ;;  %v685_v60 = vpop.f32.mrb[5].mxu1 }
 0x215   :  { %v4116_v61 = vadd.f32 %v685_v60, %v310_v55 }
 0x217   :  { %v2637_v62 = vpop.f32.mrb[6].mxu1 }
 0x218   :  { %v4118_v3 = vadd.f32 %v2637_v62, %v310_v55  ;;  %v695_v4 = vpop.f32.mrb[7].mxu1 }
 0x219   :  { %v4120_v5 = vadd.f32 %v695_v4, %v310_v55 }
 0x21b   :  { %v2640_v12 = vpop.f32.mrb[8].mxu1 }
 0x21c   :  { %v4122_v17 = vadd.f32 %v2640_v12, %v310_v55  ;;  %v705_v21 = vpop.f32.mrb[9].mxu1 }
 0x21d   :  { %v4124_v22 = vadd.f32 %v705_v21, %v310_v55 }
 0x21f   :  { %v2643_v24 = vpop.f32.mrb[10].mxu1 }
 0x220   :  { %v4126_v29 = vadd.f32 %v2643_v24, %v310_v55  ;;  %v715_v10 = vpop.f32.mrb[11].mxu1 }
 0x221   :  { %v4128_v11 = vadd.f32 %v715_v10, %v310_v55 }
 0x233   :  { %v875_v41 = vpop.f32.mrb[0].mxu1 }
 0x234   :  { %v3505_v43 = vadd.f32 %v875_v41, %v4130_v37  ;;  %v877_v44 = vpop.f32.mrb[1].mxu1 }
 0x235   :  { %v3506_v48 = vadd.f32 %v877_v44, %v4132_v42 }
 0x236   :  { %v2394_v47 = vmul.f32 -1.442695, %v3505_v43 }
 0x237   :  { %v2395_v49 = vmul.f32 -1.442695, %v3506_v48 }
 0x238   :  { %3551 = vpow2.f32 %v2394_v47 }
 0x239   :  { %3553 = vpow2.f32 %v2395_v49 }
 0x242   :  { %v3552_v50 = vpop.eup %3551 }
 0x243   :  { %v954_v53 = vadd.f32 1.0, %v3552_v50  ;;  %v3554_v54 = vpop.eup %3553 }
 0x244   :  { %v961_v8 = vadd.f32 1.0, %v3554_v54 }
 0x245   :  { %3555 = vrcp.f32 %v954_v53 }
 0x246   :  { %3557 = vrcp.f32 %v961_v8 }
 0x24f   :  { %v3556_v20 = vpop.eup %3555 }
 0x250   :  { %v965_v30 = vmul.f32 %v3556_v20, %v964_v9  ;;  %v3558_v60 = vpop.eup %3557 }
 0x251   :  { %v968_v62 = vsub.f32 1.0, %v3558_v60  ;;  %v970_v21 = vmul.f32 0.0, %v3558_v60 }
 0x252   :  { %v966_v56 = vadd.f32 %v965_v30, %v456_v26 }
 0x254   :  { %3559 = vtanh.f32 %v966_v56 }
 0x25e   :  { %v3560_v4 = vpop.eup %3559 }
 0x25f   :  { %v969_v12 = vmul.f32 %v3560_v4, %v968_v62 }
 0x261   :  { %v4142_v24 = vadd.f32 %v970_v21, %v969_v12 }
 0x263   :  { %1044 = vmatmul.mubr.f32.vlgmr.msra.gmra.mrb[2].mxu0 %v4142_v24  ;;  %2712 = vmatmul.mubr.f32.vlgmr.msra.gmra.mrb[12].mxu1 %v4142_v24 }
 0x264   :  { %3116 = vmatpush1.bf16.msra.mxu0 %v3990_v45  ;;  %3147 = vmatpush3.bf16.msra.mxu1 %v3935_v14 }
 0x265   :  { %3118 = vmatprep.subr.bf16.mxu0 %v3992_v46  ;;  %3148 = vmatprep.subr.bf16.mxu1 %v3722_v1 }
 0x266   :  { %1213 = vmatprep.mubr.f32.mxu0 %v3724_v2  ;;  %2746 = vmatprep.mubr.msk.f32.mxu1 %vm3723_vm0, %v3724_v2 }
 0x268   :  { %3120 = vmatpush1.bf16.msra.mxu0 %v3998_v51  ;;  %3150 = vmatpush3.bf16.msra.mxu1 %v3943_v18 }
 0x269   :  { %3122 = vmatprep.subr.bf16.mxu0 %v4000_v52  ;;  %3151 = vmatprep.subr.bf16.mxu1 %v3722_v1 }
 0x26c   :  { %3124 = vmatpush1.bf16.msra.mxu0 %v4004_v57  ;;  %3153 = vmatpush3.bf16.msra.mxu1 %v3952_v23 }
 0x26d   :  { %3126 = vmatprep.subr.bf16.mxu0 %v4006_v58  ;;  %3154 = vmatprep.subr.bf16.mxu1 %v3722_v1 }
 0x270   :  { %3128 = vmatpush1.bf16.msra.mxu0 %v4010_v63  ;;  %3156 = vmatpush3.bf16.msra.mxu1 %v3958_v27 }
 0x271   :  { %3130 = vmatprep.subr.bf16.mxu0 %v4012_v0  ;;  %3157 = vmatprep.subr.bf16.mxu1 %v3722_v1 }
 0x274   :  { %3132 = vmatpush1.bf16.msra.mxu0 %v4016_v13  ;;  %3159 = vmatpush3.bf16.msra.mxu1 %v3967_v31 }
 0x275   :  { %3134 = vmatprep.subr.bf16.mxu0 %v4018_v16  ;;  %3160 = vmatprep.subr.bf16.mxu1 %v3722_v1 }
 0x278   :  { %3136 = vmatpush1.bf16.msra.mxu0 %v4022_v25  ;;  %3162 = vmatpush3.bf16.msra.mxu1 %v3975_v19 }
 0x279   :  { %3138 = vmatprep.subr.bf16.mxu0 %v4024_v28  ;;  %3163 = vmatprep.subr.bf16.mxu1 %v3722_v1 }
 0x27c   :  { %3140 = vmatpush1.bf16.msra.mxu0 %v4028_v33  ;;  %3165 = vmatpush3.bf16.msra.mxu1 %v3979_v34 }
 0x27d   :  { %3142 = vmatprep.subr.bf16.mxu0 %v4030_v35  ;;  %3166 = vmatprep.subr.bf16.mxu1 %v3722_v1 }
 0x280   :  { %3144 = vmatpush1.bf16.msra.mxu0 %v4034_v38  ;;  %3168 = vmatpush3.bf16.msra.mxu1 %v3983_v39 }
 0x281   :  { %3170 = vmatprep.subr.bf16.mxu0 %v3986_v40  ;;  %3201 = vmatprep.subr.bf16.mxu1 %v3722_v1 }
 0x336   :  { %v1045_v6 = vpop.f32.mrb[2].mxu0  ;;  %v1116_v15 = vpop.f32.mrb[12].mxu1 }
 0x337   :  { %v3507_v55 = vadd.f32 %v1045_v6, %v4130_v37  ;;  %v1047_v10 = vpop.f32.mrb[3].mxu0  ;;  %v2713_v32 = vpop.f32.mrb[13].mxu1  ;;  %v1134_v50 = vadd.f32 %v4139_v7, %v1116_v15 }
 0x338   :  { %v3508_v41 = vadd.f32 %v1047_v10, %v4132_v42 }
 0x339   :  { %v2396_v36 = vmul.f32 -1.442695, %v3507_v55 }
 0x33a   :  { %v2397_v43 = vmul.f32 -1.442695, %v3508_v41 }
 0x33b   :  { %3561 = vpow2.f32 %v2396_v36 }
 0x33c   :  { %3563 = vpow2.f32 %v2397_v43 }
 0x345   :  { %v3562_v44 = vpop.eup %3561 }
 0x346   :  { %v1124_v47 = vadd.f32 1.0, %v3562_v44  ;;  %v3564_v48 = vpop.eup %3563 }
 0x347   :  { %v1131_v49 = vadd.f32 1.0, %v3564_v48 }
 0x348   :  { %3565 = vrcp.f32 %v1124_v47 }
 0x349   :  { %3567 = vrcp.f32 %v1131_v49 }
 0x352   :  { %v3566_v53 = vpop.eup %3565 }
 0x353   :  { %v1135_v54 = vmul.f32 %v3566_v53, %v1134_v50  ;;  %v3568_v9 = vpop.eup %3567 }
 0x354   :  { %v1138_v20 = vsub.f32 1.0, %v3568_v9  ;;  %v1140_v56 = vmul.f32 %v3568_v9, %v4142_v24 }
 0x355   :  { %v1136_v8 = vadd.f32 %v1135_v54, %v4116_v61 }
 0x357   :  { %3569 = vtanh.f32 %v1136_v8 }
 0x361   :  { %v3570_v26 = vpop.eup %3569 }
 0x362   :  { %v1139_v30 = vmul.f32 %v3570_v26, %v1138_v20 }
 0x364   :  { %v4186_v60 = vadd.f32 %v1140_v56, %v1139_v30 }
 0x366   :  { %1214 = vmatmul.mubr.f32.vlgmr.msra.gmra.mrb[4].mxu0 %v4186_v60  ;;  %2747 = vmatmul.mubr.f32.vlgmr.msra.gmra.mrb[14].mxu1 %v4186_v60 }
 0x367   :  { %3172 = vmatpush1.bf16.msra.mxu0 %v3990_v45  ;;  %3203 = vmatpush3.bf16.msra.mxu1 %v3935_v14 }
 0x368   :  { %3174 = vmatprep.subr.bf16.mxu0 %v3992_v46  ;;  %3204 = vmatprep.subr.bf16.mxu1 %v3722_v1 }
 0x369   :  { %1383 = vmatprep.mubr.f32.mxu0 %v3724_v2  ;;  %2781 = vmatprep.mubr.msk.f32.mxu1 %vm3723_vm0, %v3724_v2 }
 0x36b   :  { %3176 = vmatpush1.bf16.msra.mxu0 %v3998_v51  ;;  %3206 = vmatpush3.bf16.msra.mxu1 %v3943_v18 }
 0x36c   :  { %3178 = vmatprep.subr.bf16.mxu0 %v4000_v52  ;;  %3207 = vmatprep.subr.bf16.mxu1 %v3722_v1 }
 0x36f   :  { %3180 = vmatpush1.bf16.msra.mxu0 %v4004_v57  ;;  %3209 = vmatpush3.bf16.msra.mxu1 %v3952_v23 }
 0x370   :  { %3182 = vmatprep.subr.bf16.mxu0 %v4006_v58  ;;  %3210 = vmatprep.subr.bf16.mxu1 %v3722_v1 }
 0x373   :  { %3184 = vmatpush1.bf16.msra.mxu0 %v4010_v63  ;;  %3212 = vmatpush3.bf16.msra.mxu1 %v3958_v27 }
 0x374   :  { %3186 = vmatprep.subr.bf16.mxu0 %v4012_v0  ;;  %3213 = vmatprep.subr.bf16.mxu1 %v3722_v1 }
 0x377   :  { %3188 = vmatpush1.bf16.msra.mxu0 %v4016_v13  ;;  %3215 = vmatpush3.bf16.msra.mxu1 %v3967_v31 }
 0x378   :  { %3190 = vmatprep.subr.bf16.mxu0 %v4018_v16  ;;  %3216 = vmatprep.subr.bf16.mxu1 %v3722_v1 }
 0x37b   :  { %3192 = vmatpush1.bf16.msra.mxu0 %v4022_v25  ;;  %3218 = vmatpush3.bf16.msra.mxu1 %v3975_v19 }
 0x37c   :  { %3194 = vmatprep.subr.bf16.mxu0 %v4024_v28  ;;  %3219 = vmatprep.subr.bf16.mxu1 %v3722_v1 }
 0x37f   :  { %3196 = vmatpush1.bf16.msra.mxu0 %v4028_v33  ;;  %3221 = vmatpush3.bf16.msra.mxu1 %v3979_v34 }
 0x380   :  { %3198 = vmatprep.subr.bf16.mxu0 %v4030_v35  ;;  %3222 = vmatprep.subr.bf16.mxu1 %v3722_v1 }
 0x383   :  { %3200 = vmatpush1.bf16.msra.mxu0 %v4034_v38  ;;  %3224 = vmatpush3.bf16.msra.mxu1 %v3983_v39 }
 0x384   :  { %3226 = vmatprep.subr.bf16.mxu0 %v3986_v40  ;;  %3257 = vmatprep.subr.bf16.mxu1 %v3722_v1 }
 0x439   :  { %v1215_v61 = vpop.f32.mrb[4].mxu0  ;;  %v1286_v62 = vpop.f32.mrb[14].mxu1 }
 0x43a   :  { %v3509_v4 = vadd.f32 %v1215_v61, %v4130_v37  ;;  %v1217_v12 = vpop.f32.mrb[5].mxu0  ;;  %v2748_v21 = vpop.f32.mrb[15].mxu1  ;;  %v1304_v43 = vadd.f32 %v4139_v7, %v1286_v62 }
 0x43b   :  { %v3510_v15 = vadd.f32 %v1217_v12, %v4132_v42 }
 0x43c   :  { %v2398_v6 = vmul.f32 -1.442695, %v3509_v4 }
 0x43d   :  { %v2399_v55 = vmul.f32 -1.442695, %v3510_v15 }
 0x43e   :  { %3571 = vpow2.f32 %v2398_v6 }
 0x43f   :  { %3573 = vpow2.f32 %v2399_v55 }
 0x448   :  { %v3572_v10 = vpop.eup %3571 }
 0x449   :  { %v1294_v32 = vadd.f32 1.0, %v3572_v10  ;;  %v3574_v36 = vpop.eup %3573 }
 0x44a   :  { %v1301_v41 = vadd.f32 1.0, %v3574_v36 }
 0x44b   :  { %3575 = vrcp.f32 %v1294_v32 }
 0x44c   :  { %3577 = vrcp.f32 %v1301_v41 }
 0x455   :  { %v3576_v44 = vpop.eup %3575 }
 0x456   :  { %v1305_v47 = vmul.f32 %v3576_v44, %v1304_v43  ;;  %v3578_v49 = vpop.eup %3577 }
 0x457   :  { %v1308_v50 = vsub.f32 1.0, %v3578_v49  ;;  %v1310_v8 = vmul.f32 %v3578_v49, %v4186_v60 }
 0x458   :  { %v1306_v48 = vadd.f32 %v1305_v47, %v4114_v59 }
 0x45a   :  { %3579 = vtanh.f32 %v1306_v48 }
 0x464   :  { %v3580_v53 = vpop.eup %3579 }
 0x465   :  { %v1309_v54 = vmul.f32 %v3580_v53, %v1308_v50 }
 0x467   :  { %v4230_v9 = vadd.f32 %v1310_v8, %v1309_v54 }
 0x469   :  { %1384 = vmatmul.mubr.f32.vlgmr.msra.gmra.mrb[6].mxu0 %v4230_v9  ;;  %2782 = vmatmul.mubr.f32.vlgmr.msra.gmra.mrb[16].mxu1 %v4230_v9 }
 0x46a   :  { %3228 = vmatpush1.bf16.msra.mxu0 %v3990_v45  ;;  %3259 = vmatpush3.bf16.msra.mxu1 %v3935_v14 }
 0x46b   :  { %3230 = vmatprep.subr.bf16.mxu0 %v3992_v46  ;;  %3260 = vmatprep.subr.bf16.mxu1 %v3722_v1 }
 0x46c   :  { %1553 = vmatprep.mubr.f32.mxu0 %v3724_v2  ;;  %2816 = vmatprep.mubr.msk.f32.mxu1 %vm3723_vm0, %v3724_v2 }
 0x46e   :  { %3232 = vmatpush1.bf16.msra.mxu0 %v3998_v51  ;;  %3262 = vmatpush3.bf16.msra.mxu1 %v3943_v18 }
 0x46f   :  { %3234 = vmatprep.subr.bf16.mxu0 %v4000_v52  ;;  %3263 = vmatprep.subr.bf16.mxu1 %v3722_v1 }
 0x472   :  { %3236 = vmatpush1.bf16.msra.mxu0 %v4004_v57  ;;  %3265 = vmatpush3.bf16.msra.mxu1 %v3952_v23 }
 0x473   :  { %3238 = vmatprep.subr.bf16.mxu0 %v4006_v58  ;;  %3266 = vmatprep.subr.bf16.mxu1 %v3722_v1 }
 0x476   :  { %3240 = vmatpush1.bf16.msra.mxu0 %v4010_v63  ;;  %3268 = vmatpush3.bf16.msra.mxu1 %v3958_v27 }
 0x477   :  { %3242 = vmatprep.subr.bf16.mxu0 %v4012_v0  ;;  %3269 = vmatprep.subr.bf16.mxu1 %v3722_v1 }
 0x47a   :  { %3244 = vmatpush1.bf16.msra.mxu0 %v4016_v13  ;;  %3271 = vmatpush3.bf16.msra.mxu1 %v3967_v31 }
 0x47b   :  { %3246 = vmatprep.subr.bf16.mxu0 %v4018_v16  ;;  %3272 = vmatprep.subr.bf16.mxu1 %v3722_v1 }
 0x47e   :  { %3248 = vmatpush1.bf16.msra.mxu0 %v4022_v25  ;;  %3274 = vmatpush3.bf16.msra.mxu1 %v3975_v19 }
 0x47f   :  { %3250 = vmatprep.subr.bf16.mxu0 %v4024_v28  ;;  %3275 = vmatprep.subr.bf16.mxu1 %v3722_v1 }
 0x482   :  { %3252 = vmatpush1.bf16.msra.mxu0 %v4028_v33  ;;  %3277 = vmatpush3.bf16.msra.mxu1 %v3979_v34 }
 0x483   :  { %3254 = vmatprep.subr.bf16.mxu0 %v4030_v35  ;;  %3278 = vmatprep.subr.bf16.mxu1 %v3722_v1 }
 0x486   :  { %3256 = vmatpush1.bf16.msra.mxu0 %v4034_v38  ;;  %3280 = vmatpush3.bf16.msra.mxu1 %v3983_v39 }
 0x487   :  { %3282 = vmatprep.subr.bf16.mxu0 %v3986_v40  ;;  %3313 = vmatprep.subr.bf16.mxu1 %v3722_v1 }
 0x53c   :  { %v1385_v59 = vpop.f32.mrb[6].mxu0  ;;  %v1456_v20 = vpop.f32.mrb[16].mxu1 }
 0x53d   :  { %v3511_v26 = vadd.f32 %v1385_v59, %v4130_v37  ;;  %v1387_v30 = vpop.f32.mrb[7].mxu0  ;;  %v2783_v56 = vpop.f32.mrb[17].mxu1  ;;  %v1474_v55 = vadd.f32 %v4139_v7, %v1456_v20 }
 0x53e   :  { %v3512_v62 = vadd.f32 %v1387_v30, %v4132_v42 }
 0x53f   :  { %v2400_v61 = vmul.f32 -1.442695, %v3511_v26 }
 0x540   :  { %v2401_v4 = vmul.f32 -1.442695, %v3512_v62 }
 0x541   :  { %3581 = vpow2.f32 %v2400_v61 }
 0x542   :  { %3583 = vpow2.f32 %v2401_v4 }
 0x54b   :  { %v3582_v12 = vpop.eup %3581 }
 0x54c   :  { %v1464_v21 = vadd.f32 1.0, %v3582_v12  ;;  %v3584_v6 = vpop.eup %3583 }
 0x54d   :  { %v1471_v15 = vadd.f32 1.0, %v3584_v6 }
 0x54e   :  { %3585 = vrcp.f32 %v1464_v21 }
 0x54f   :  { %3587 = vrcp.f32 %v1471_v15 }
 0x558   :  { %v3586_v10 = vpop.eup %3585 }
 0x559   :  { %v1475_v32 = vmul.f32 %v3586_v10, %v1474_v55  ;;  %v3588_v41 = vpop.eup %3587 }
 0x55a   :  { %v1478_v43 = vsub.f32 1.0, %v3588_v41  ;;  %v1480_v48 = vmul.f32 %v3588_v41, %v4230_v9 }
 0x55b   :  { %v1476_v36 = vadd.f32 %v1475_v32, %v4120_v5 }
 0x55d   :  { %3589 = vtanh.f32 %v1476_v36 }
 0x567   :  { %v3590_v44 = vpop.eup %3589 }
 0x568   :  { %v1479_v47 = vmul.f32 %v3590_v44, %v1478_v43 }
 0x56a   :  { %v4274_v49 = vadd.f32 %v1480_v48, %v1479_v47 }
 0x56c   :  { %1554 = vmatmul.mubr.f32.vlgmr.msra.gmra.mrb[8].mxu0 %v4274_v49  ;;  %2817 = vmatmul.mubr.f32.vlgmr.msra.gmra.mrb[18].mxu1 %v4274_v49 }
 0x56d   :  { %3284 = vmatpush1.bf16.msra.mxu0 %v3990_v45  ;;  %3315 = vmatpush3.bf16.msra.mxu1 %v3935_v14 }
 0x56e   :  { %3286 = vmatprep.subr.bf16.mxu0 %v3992_v46  ;;  %3316 = vmatprep.subr.bf16.mxu1 %v3722_v1 }
 0x56f   :  { %1723 = vmatprep.mubr.f32.mxu0 %v3724_v2  ;;  %2851 = vmatprep.mubr.msk.f32.mxu1 %vm3723_vm0, %v3724_v2 }
 0x571   :  { %3288 = vmatpush1.bf16.msra.mxu0 %v3998_v51  ;;  %3318 = vmatpush3.bf16.msra.mxu1 %v3943_v18 }
 0x572   :  { %3290 = vmatprep.subr.bf16.mxu0 %v4000_v52  ;;  %3319 = vmatprep.subr.bf16.mxu1 %v3722_v1 }
 0x575   :  { %3292 = vmatpush1.bf16.msra.mxu0 %v4004_v57  ;;  %3321 = vmatpush3.bf16.msra.mxu1 %v3952_v23 }
 0x576   :  { %3294 = vmatprep.subr.bf16.mxu0 %v4006_v58  ;;  %3322 = vmatprep.subr.bf16.mxu1 %v3722_v1 }
 0x579   :  { %3296 = vmatpush1.bf16.msra.mxu0 %v4010_v63  ;;  %3324 = vmatpush3.bf16.msra.mxu1 %v3958_v27 }
 0x57a   :  { %3298 = vmatprep.subr.bf16.mxu0 %v4012_v0  ;;  %3325 = vmatprep.subr.bf16.mxu1 %v3722_v1 }
 0x57d   :  { %3300 = vmatpush1.bf16.msra.mxu0 %v4016_v13  ;;  %3327 = vmatpush3.bf16.msra.mxu1 %v3967_v31 }
 0x57e   :  { %3302 = vmatprep.subr.bf16.mxu0 %v4018_v16  ;;  %3328 = vmatprep.subr.bf16.mxu1 %v3722_v1 }
 0x581   :  { %3304 = vmatpush1.bf16.msra.mxu0 %v4022_v25  ;;  %3330 = vmatpush3.bf16.msra.mxu1 %v3975_v19 }
 0x582   :  { %3306 = vmatprep.subr.bf16.mxu0 %v4024_v28  ;;  %3331 = vmatprep.subr.bf16.mxu1 %v3722_v1 }
 0x585   :  { %3308 = vmatpush1.bf16.msra.mxu0 %v4028_v33  ;;  %3333 = vmatpush3.bf16.msra.mxu1 %v3979_v34 }
 0x586   :  { %3310 = vmatprep.subr.bf16.mxu0 %v4030_v35  ;;  %3334 = vmatprep.subr.bf16.mxu1 %v3722_v1 }
 0x589   :  { %3312 = vmatpush1.bf16.msra.mxu0 %v4034_v38  ;;  %3336 = vmatpush3.bf16.msra.mxu1 %v3983_v39 }
 0x58a   :  { %3338 = vmatprep.subr.bf16.mxu0 %v3986_v40  ;;  %3369 = vmatprep.subr.bf16.mxu1 %v3722_v1 }
 0x63f   :  { %v1555_v5 = vpop.f32.mrb[8].mxu0  ;;  %v1626_v50 = vpop.f32.mrb[18].mxu1 }
 0x640   :  { %v3513_v53 = vadd.f32 %v1555_v5, %v4130_v37  ;;  %v1557_v54 = vpop.f32.mrb[9].mxu0  ;;  %v2818_v8 = vpop.f32.mrb[19].mxu1  ;;  %v1644_v4 = vadd.f32 %v4139_v7, %v1626_v50 }
 0x641   :  { %v3514_v20 = vadd.f32 %v1557_v54, %v4132_v42 }
 0x642   :  { %v2402_v59 = vmul.f32 -1.442695, %v3513_v53 }
 0x643   :  { %v2403_v26 = vmul.f32 -1.442695, %v3514_v20 }
 0x644   :  { %3591 = vpow2.f32 %v2402_v59 }
 0x645   :  { %3593 = vpow2.f32 %v2403_v26 }
 0x64e   :  { %v3592_v30 = vpop.eup %3591 }
 0x64f   :  { %v1634_v56 = vadd.f32 1.0, %v3592_v30  ;;  %v3594_v61 = vpop.eup %3593 }
 0x650   :  { %v1641_v62 = vadd.f32 1.0, %v3594_v61 }
 0x651   :  { %3595 = vrcp.f32 %v1634_v56 }
 0x652   :  { %3597 = vrcp.f32 %v1641_v62 }
 0x65b   :  { %v3596_v12 = vpop.eup %3595 }
 0x65c   :  { %v1645_v21 = vmul.f32 %v3596_v12, %v1644_v4  ;;  %v3598_v15 = vpop.eup %3597 }
 0x65d   :  { %v1648_v55 = vsub.f32 1.0, %v3598_v15  ;;  %v1650_v36 = vmul.f32 %v3598_v15, %v4274_v49 }
 0x65e   :  { %v1646_v6 = vadd.f32 %v1645_v21, %v4118_v3 }
 0x660   :  { %3599 = vtanh.f32 %v1646_v6 }
 0x66a   :  { %v3600_v10 = vpop.eup %3599 }
 0x66b   :  { %v1649_v32 = vmul.f32 %v3600_v10, %v1648_v55 }
 0x66d   :  { %v4318_v41 = vadd.f32 %v1650_v36, %v1649_v32 }
 0x66f   :  { %1724 = vmatmul.mubr.f32.vlgmr.msra.gmra.mrb[10].mxu0 %v4318_v41  ;;  %2852 = vmatmul.mubr.f32.vlgmr.msra.gmra.mrb[20].mxu1 %v4318_v41 }
 0x670   :  { %3340 = vmatpush1.bf16.msra.mxu0 %v3990_v45  ;;  %3371 = vmatpush3.bf16.msra.mxu1 %v3935_v14 }
 0x671   :  { %3342 = vmatprep.subr.bf16.mxu0 %v3992_v46  ;;  %3372 = vmatprep.subr.bf16.mxu1 %v3722_v1 }
 0x672   :  { %1893 = vmatprep.mubr.f32.mxu0 %v3724_v2  ;;  %2886 = vmatprep.mubr.msk.f32.mxu1 %vm3723_vm0, %v3724_v2 }
 0x674   :  { %3344 = vmatpush1.bf16.msra.mxu0 %v3998_v51  ;;  %3374 = vmatpush3.bf16.msra.mxu1 %v3943_v18 }
 0x675   :  { %3346 = vmatprep.subr.bf16.mxu0 %v4000_v52  ;;  %3375 = vmatprep.subr.bf16.mxu1 %v3722_v1 }
 0x678   :  { %3348 = vmatpush1.bf16.msra.mxu0 %v4004_v57  ;;  %3377 = vmatpush3.bf16.msra.mxu1 %v3952_v23 }
 0x679   :  { %3350 = vmatprep.subr.bf16.mxu0 %v4006_v58  ;;  %3378 = vmatprep.subr.bf16.mxu1 %v3722_v1 }
 0x67c   :  { %3352 = vmatpush1.bf16.msra.mxu0 %v4010_v63  ;;  %3380 = vmatpush3.bf16.msra.mxu1 %v3958_v27 }
 0x67d   :  { %3354 = vmatprep.subr.bf16.mxu0 %v4012_v0  ;;  %3381 = vmatprep.subr.bf16.mxu1 %v3722_v1 }
 0x680   :  { %3356 = vmatpush1.bf16.msra.mxu0 %v4016_v13  ;;  %3383 = vmatpush3.bf16.msra.mxu1 %v3967_v31 }
 0x681   :  { %3358 = vmatprep.subr.bf16.mxu0 %v4018_v16  ;;  %3384 = vmatprep.subr.bf16.mxu1 %v3722_v1 }
 0x684   :  { %3360 = vmatpush1.bf16.msra.mxu0 %v4022_v25  ;;  %3386 = vmatpush3.bf16.msra.mxu1 %v3975_v19 }
 0x685   :  { %3362 = vmatprep.subr.bf16.mxu0 %v4024_v28  ;;  %3387 = vmatprep.subr.bf16.mxu1 %v3722_v1 }
 0x688   :  { %3364 = vmatpush1.bf16.msra.mxu0 %v4028_v33  ;;  %3389 = vmatpush3.bf16.msra.mxu1 %v3979_v34 }
 0x689   :  { %3366 = vmatprep.subr.bf16.mxu0 %v4030_v35  ;;  %3390 = vmatprep.subr.bf16.mxu1 %v3722_v1 }
 0x68c   :  { %3368 = vmatpush1.bf16.msra.mxu0 %v4034_v38  ;;  %3392 = vmatpush3.bf16.msra.mxu1 %v3983_v39 }
 0x68d   :  { %3394 = vmatprep.subr.bf16.mxu0 %v3986_v40  ;;  %3425 = vmatprep.subr.bf16.mxu1 %v3722_v1 }
 0x742   :  { %v1725_v3 = vpop.f32.mrb[10].mxu0  ;;  %v1796_v43 = vpop.f32.mrb[20].mxu1 }
 0x743   :  { %v3515_v44 = vadd.f32 %v1725_v3, %v4130_v37  ;;  %v1727_v47 = vpop.f32.mrb[11].mxu0  ;;  %v2853_v48 = vpop.f32.mrb[21].mxu1  ;;  %v1814_v26 = vadd.f32 %v4139_v7, %v1796_v43 }
 0x744   :  { %v3516_v50 = vadd.f32 %v1727_v47, %v4132_v42 }
 0x745   :  { %v2404_v5 = vmul.f32 -1.442695, %v3515_v44 }
 0x746   :  { %v2405_v53 = vmul.f32 -1.442695, %v3516_v50 }
 0x747   :  { %3601 = vpow2.f32 %v2404_v5 }
 0x748   :  { %3603 = vpow2.f32 %v2405_v53 }
 0x751   :  { %v3602_v54 = vpop.eup %3601 }
 0x752   :  { %v1804_v8 = vadd.f32 1.0, %v3602_v54  ;;  %v3604_v59 = vpop.eup %3603 }
 0x753   :  { %v1811_v20 = vadd.f32 1.0, %v3604_v59 }
 0x754   :  { %3605 = vrcp.f32 %v1804_v8 }
 0x755   :  { %3607 = vrcp.f32 %v1811_v20 }
 0x75e   :  { %v3606_v30 = vpop.eup %3605 }
 0x75f   :  { %v1815_v56 = vmul.f32 %v3606_v30, %v1814_v26  ;;  %v3608_v62 = vpop.eup %3607 }
 0x760   :  { %v1818_v4 = vsub.f32 1.0, %v3608_v62  ;;  %v1820_v6 = vmul.f32 %v3608_v62, %v4318_v41 }
 0x761   :  { %v1816_v61 = vadd.f32 %v1815_v56, %v4124_v22 }
 0x763   :  { %3609 = vtanh.f32 %v1816_v61 }
 0x76d   :  { %v3610_v12 = vpop.eup %3609 }
 0x76e   :  { %v1819_v21 = vmul.f32 %v3610_v12, %v1818_v4 }
 0x770   :  { %v4362_v15 = vadd.f32 %v1820_v6, %v1819_v21 }
 0x772   :  { %1894 = vmatmul.mubr.f32.vlgmr.msra.gmra.mrb[12].mxu0 %v4362_v15  ;;  %2887 = vmatmul.mubr.f32.vlgmr.msra.gmra.mrb[22].mxu1 %v4362_v15 }
 0x773   :  { %3396 = vmatpush1.bf16.msra.mxu0 %v3990_v45  ;;  %3427 = vmatpush3.bf16.msra.mxu1 %v3935_v14 }
 0x774   :  { %3398 = vmatprep.subr.bf16.mxu0 %v3992_v46  ;;  %3428 = vmatprep.subr.bf16.mxu1 %v3722_v1 }
 0x775   :  { %2063 = vmatprep.mubr.f32.mxu0 %v3724_v2  ;;  %2921 = vmatprep.mubr.msk.f32.mxu1 %vm3723_vm0, %v3724_v2 }
 0x777   :  { %3400 = vmatpush1.bf16.msra.mxu0 %v3998_v51  ;;  %3430 = vmatpush3.bf16.msra.mxu1 %v3943_v18 }
 0x778   :  { %3402 = vmatprep.subr.bf16.mxu0 %v4000_v52  ;;  %3431 = vmatprep.subr.bf16.mxu1 %v3722_v1 }
 0x77b   :  { %3404 = vmatpush1.bf16.msra.mxu0 %v4004_v57  ;;  %3433 = vmatpush3.bf16.msra.mxu1 %v3952_v23 }
 0x77c   :  { %3406 = vmatprep.subr.bf16.mxu0 %v4006_v58  ;;  %3434 = vmatprep.subr.bf16.mxu1 %v3722_v1 }
 0x77f   :  { %3408 = vmatpush1.bf16.msra.mxu0 %v4010_v63  ;;  %3436 = vmatpush3.bf16.msra.mxu1 %v3958_v27 }
 0x780   :  { %3410 = vmatprep.subr.bf16.mxu0 %v4012_v0  ;;  %3437 = vmatprep.subr.bf16.mxu1 %v3722_v1 }
 0x783   :  { %3412 = vmatpush1.bf16.msra.mxu0 %v4016_v13  ;;  %3439 = vmatpush3.bf16.msra.mxu1 %v3967_v31 }
 0x784   :  { %3414 = vmatprep.subr.bf16.mxu0 %v4018_v16  ;;  %3440 = vmatprep.subr.bf16.mxu1 %v3722_v1 }
 0x787   :  { %3416 = vmatpush1.bf16.msra.mxu0 %v4022_v25  ;;  %3442 = vmatpush3.bf16.msra.mxu1 %v3975_v19 }
 0x788   :  { %3418 = vmatprep.subr.bf16.mxu0 %v4024_v28  ;;  %3443 = vmatprep.subr.bf16.mxu1 %v3722_v1 }
 0x78b   :  { %3420 = vmatpush1.bf16.msra.mxu0 %v4028_v33  ;;  %3445 = vmatpush3.bf16.msra.mxu1 %v3979_v34 }
 0x78c   :  { %3422 = vmatprep.subr.bf16.mxu0 %v4030_v35  ;;  %3446 = vmatprep.subr.bf16.mxu1 %v3722_v1 }
 0x78f   :  { %3424 = vmatpush1.bf16.msra.mxu0 %v4034_v38  ;;  %3448 = vmatpush3.bf16.msra.mxu1 %v3983_v39 }
 0x790   :  { %3450 = vmatprep.subr.bf16.mxu0 %v3986_v40  ;;  %3481 = vmatprep.subr.bf16.mxu1 %v3722_v1 }
 0x845   :  { %v1895_v22 = vpop.f32.mrb[12].mxu0  ;;  %v1966_v55 = vpop.f32.mrb[22].mxu1 }
 0x846   :  { %v3517_v10 = vadd.f32 %v1895_v22, %v4130_v37  ;;  %v1897_v32 = vpop.f32.mrb[13].mxu0  ;;  %v2888_v36 = vpop.f32.mrb[23].mxu1  ;;  %v1984_v40 = vadd.f32 %v4139_v7, %v1966_v55 }
 0x847   :  { %v3518_v43 = vadd.f32 %v1897_v32, %v4132_v42 }
 0x848   :  { %v2406_v3 = vmul.f32 -1.442695, %v3517_v10 }
 0x849   :  { %v2407_v44 = vmul.f32 -1.442695, %v3518_v43 }
 0x84a   :  { %3611 = vpow2.f32 %v2406_v3  ;;  %v1142_v3 = vadd.f32 %v4186_v60, %v4142_v24  ;;  %v2412_v24 = vld [vmem:[%s4473_s8] ss:$0 sm:$0xff] }
 0x84b   :  { %3613 = vpow2.f32 %v2407_v44 }
 0x854   :  { %v3612_v47 = vpop.eup %3611 }
 0x855   :  { %v1974_v48 = vadd.f32 1.0, %v3612_v47  ;;  %v3614_v5 = vpop.eup %3613 }
 0x856   :  { %v1981_v50 = vadd.f32 1.0, %v3614_v5 }
 0x857   :  { %3615 = vrcp.f32 %v1974_v48 }
 0x858   :  { %3617 = vrcp.f32 %v1981_v50 }
 0x861   :  { %v3616_v53 = vpop.eup %3615 }
 0x862   :  { %v1985_v54 = vmul.f32 %v3616_v53, %v1984_v40  ;;  %v3618_v59 = vpop.eup %3617 }
 0x863   :  { %v1988_v20 = vsub.f32 1.0, %v3618_v59  ;;  %v1990_v56 = vmul.f32 %v3618_v59, %v4362_v15 }
 0x864   :  { %v1986_v8 = vadd.f32 %v1985_v54, %v4122_v17 }
 0x866   :  { %3619 = vtanh.f32 %v1986_v8 }
 0x870   :  { %v3620_v26 = vpop.eup %3619 }
 0x871   :  { %v1989_v30 = vmul.f32 %v3620_v26, %v1988_v20 }
 0x873   :  { %v4406_v61 = vadd.f32 %v1990_v56, %v1989_v30 }
 0x875   :  { %2064 = vmatmul.mubr.f32.vlgmr.msra.gmra.mrb[14].mxu0 %v4406_v61  ;;  %2922 = vmatmul.mubr.f32.vlgmr.msra.gmra.mrb[24].mxu1 %v4406_v61 }
 0x876   :  { %3452 = vmatpush1.bf16.msra.mxu0 %v3990_v45  ;;  %3483 = vmatpush3.bf16.msra.mxu1 %v3935_v14 }
 0x877   :  { %3454 = vmatprep.subr.bf16.mxu0 %v3992_v46  ;;  %3484 = vmatprep.subr.bf16.mxu1 %v3722_v1 }
 0x878   :  { %2233 = vmatprep.mubr.f32.mxu0 %v3724_v2  ;;  %2956 = vmatprep.mubr.msk.f32.mxu1 %vm3723_vm0, %v3724_v2 }
 0x87a   :  { %3456 = vmatpush1.bf16.msra.mxu0 %v3998_v51  ;;  %3486 = vmatpush3.bf16.msra.mxu1 %v3943_v18 }
 0x87b   :  { %3458 = vmatprep.subr.bf16.mxu0 %v4000_v52  ;;  %3487 = vmatprep.subr.bf16.mxu1 %v3722_v1 }
 0x87e   :  { %3460 = vmatpush1.bf16.msra.mxu0 %v4004_v57  ;;  %3489 = vmatpush3.bf16.msra.mxu1 %v3952_v23 }
 0x87f   :  { %3462 = vmatprep.subr.bf16.mxu0 %v4006_v58  ;;  %3490 = vmatprep.subr.bf16.mxu1 %v3722_v1 }
 0x882   :  { %3464 = vmatpush1.bf16.msra.mxu0 %v4010_v63  ;;  %3492 = vmatpush3.bf16.msra.mxu1 %v3958_v27 }
 0x883   :  { %3466 = vmatprep.subr.bf16.mxu0 %v4012_v0  ;;  %3493 = vmatprep.subr.bf16.mxu1 %v3722_v1 }
 0x886   :  { %3468 = vmatpush1.bf16.msra.mxu0 %v4016_v13  ;;  %3495 = vmatpush3.bf16.msra.mxu1 %v3967_v31 }
 0x887   :  { %3470 = vmatprep.subr.bf16.mxu0 %v4018_v16  ;;  %3496 = vmatprep.subr.bf16.mxu1 %v3722_v1 }
 0x88a   :  { %3472 = vmatpush1.bf16.msra.mxu0 %v4022_v25  ;;  %3498 = vmatpush3.bf16.msra.mxu1 %v3975_v19 }
 0x88b   :  { %3474 = vmatprep.subr.bf16.mxu0 %v4024_v28  ;;  %3499 = vmatprep.subr.bf16.mxu1 %v3722_v1 }
 0x88e   :  { %3476 = vmatpush1.bf16.msra.mxu0 %v4028_v33  ;;  %3501 = vmatpush3.bf16.msra.mxu1 %v3979_v34 }
 0x88f   :  { %3478 = vmatprep.subr.bf16.mxu0 %v4030_v35  ;;  %3502 = vmatprep.subr.bf16.mxu1 %v3722_v1 }
 0x892   :  { %3480 = vmatpush1.bf16.msra.mxu0 %v4034_v38  ;;  %3504 = vmatpush3.bf16.msra.mxu1 %v3983_v39 }
 0x948   :  { %v2065_v2 = vpop.f32.mrb[14].mxu0  ;;  %v2136_v14 = vpop.f32.mrb[24].mxu1 }
 0x949   :  { %v3519_v18 = vadd.f32 %v2065_v2, %v4130_v37  ;;  %v2067_v23 = vpop.f32.mrb[15].mxu0  ;;  %v2923_v27 = vpop.f32.mrb[25].mxu1  ;;  %v2154_v52 = vadd.f32 %v4139_v7, %v2136_v14 }
 0x94a   :  { %v3520_v19 = vadd.f32 %v2067_v23, %v4132_v42 }
 0x94b   :  { %v2408_v31 = vmul.f32 -1.442695, %v3519_v18 }
 0x94c   :  { %v2409_v45 = vmul.f32 -1.442695, %v3520_v19 }
 0x94d   :  { %3621 = vpow2.f32 %v2408_v31 }
 0x94e   :  { %3623 = vpow2.f32 %v2409_v45 }
 0x957   :  { %v3622_v34 = vpop.eup %3621 }
 0x958   :  { %v2144_v46 = vadd.f32 1.0, %v3622_v34  ;;  %v3624_v1 = vpop.eup %3623 }
 0x959   :  { %v2151_v51 = vadd.f32 1.0, %v3624_v1 }
 0x95a   :  { %3625 = vrcp.f32 %v2144_v46 }
 0x95b   :  { %3627 = vrcp.f32 %v2151_v51 }
 0x964   :  { %v3626_v39 = vpop.eup %3625 }
 0x965   :  { %v2155_v57 = vmul.f32 %v3626_v39, %v2154_v52  ;;  %v3628_v63 = vpop.eup %3627 }
 0x966   :  { %v2158_v0 = vsub.f32 1.0, %v3628_v63  ;;  %v2160_v25 = vmul.f32 %v3628_v63, %v4406_v61 }
 0x967   :  { %v2156_v58 = vadd.f32 %v2155_v57, %v4128_v11 }
 0x969   :  { %3629 = vtanh.f32 %v2156_v58 }
 0x973   :  { %v3630_v13 = vpop.eup %3629 }
 0x974   :  { %v2159_v16 = vmul.f32 %v3630_v13, %v2158_v0 }
 0x976   :  { %v2161_v28 = vadd.f32 %v2160_v25, %v2159_v16 }
 0x978   :  { %2234 = vmatmul.mubr.f32.vlgmr.msra.gmra.mrb[16].mxu0 %v2161_v28  ;;  %2957 = vmatmul.mubr.f32.vlgmr.msra.gmra.mrb[26].mxu1 %v2161_v28 }
 0xa4b   :  { %v2235_v33 = vpop.f32.mrb[16].mxu0  ;;  %v2306_v35 = vpop.f32.mrb[26].mxu1 }
 0xa4c   :  { %v3521_v38 = vadd.f32 %v2235_v33, %v4130_v37  ;;  %v2237_v17 = vpop.f32.mrb[17].mxu0  ;;  %v2958_v62 = vpop.f32.mrb[27].mxu1  ;;  %v2324_v10 = vadd.f32 %v4139_v7, %v2306_v35 }
 0xa4d   :  { %v3522_v12 = vadd.f32 %v2237_v17, %v4132_v42  ;;  %v1312_v42 = vadd.f32 %v4230_v9, %v1142_v3 }
 0xa4e   :  { %v2410_v4 = vmul.f32 -1.442695, %v3521_v38 }
 0xa4f   :  { %v2411_v11 = vmul.f32 -1.442695, %v3522_v12  ;;  %v1482_v43 = vadd.f32 %v4274_v49, %v1312_v42  ;;  %v2413_v49 = vld [vmem:[#allocation3] ss:$0 sm:$0xff] }
 0xa50   :  { %3631 = vpow2.f32 %v2410_v4 }
 0xa51   :  { %3633 = vpow2.f32 %v2411_v11  ;;  %v1652_v47 = vadd.f32 %v4318_v41, %v1482_v43 }
 0xa53   :  { %v1822_v48 = vadd.f32 %v4362_v15, %v1652_v47 }
 0xa55   :  { %v1992_v50 = vadd.f32 %v4406_v61, %v1822_v48 }
 0xa5a   :  { %v3632_v21 = vpop.eup %3631 }
 0xa5b   :  { %v2314_v6 = vadd.f32 1.0, %v3632_v21  ;;  %v3634_v22 = vpop.eup %3633 }
 0xa5c   :  { %v2321_v55 = vadd.f32 1.0, %v3634_v22 }
 0xa5d   :  { %3635 = vrcp.f32 %v2314_v6 }
 0xa5e   :  { %3637 = vrcp.f32 %v2321_v55 }
 0xa67   :  { %v3636_v32 = vpop.eup %3635 }
 0xa68   :  { %v2325_v36 = vmul.f32 %v3636_v32, %v2324_v10  ;;  %v3638_v44 = vpop.eup %3637 }
 0xa69   :  { %v2328_v5 = vsub.f32 1.0, %v3638_v44  ;;  %v2330_v53 = vmul.f32 %v3638_v44, %v2161_v28 }
 0xa6a   :  { %v2326_v37 = vadd.f32 %v2325_v36, %v4126_v29  ;;  %v2162_v29 = vadd.f32 %v2161_v28, %v1992_v50 }
 0xa6c   :  { %3639 = vtanh.f32 %v2326_v37 }
 0xa76   :  { %v3640_v7 = vpop.eup %3639 }
 0xa77   :  { %v2329_v40 = vmul.f32 %v3640_v7, %v2328_v5 }
 0xa79   :  { %v2331_v54 = vadd.f32 %v2330_v53, %v2329_v40 }
 0xa7b   :  { %v2332_v60 = vadd.f32 %v2331_v54, %v2162_v29 }
 0xa7d   :  { %v2340_v9 = vmul.f32 %v2412_v24, %v2332_v60 }
 0xa7f   :  { %2341 = vadd.xlane.f32.xlu0 %v2340_v9 }
 0xb0c   :  { %v2342_v8 = vpop.xlane.xlu0 %2341 }
 0xb0d   :  { %v2350_v41 = vadd.f32 %v2413_v49, %v2342_v8 }
 0xb0f   :  { %v2414_v59 = vmul.f32 -1.442695, %v2350_v41 }
 0xb11   :  { %3641 = vpow2.f32 %v2414_v59 }
 0xb1b   :  { %v3642_v15 = vpop.eup %3641 }
 0xb1c   :  { %v2354_v20 = vadd.f32 1.0, %v3642_v15 }
 0xb1e   :  { %3643 = vrcp.f32 %v2354_v20 }
 0xb28   :  { %v3644_v26 = vpop.eup %3643 }
 0xb29   :  { %2358 = vst.msk [vmem:[%s4475_s10] sm:$0xff] %vm2357_vm10, %v3644_v26 }
 0xb2a   :  { %2363 = vsyncpa [#allocation5], 1 }
 0xb2b   :  { %2364 = vsyncpa [#allocation7], 1 }

</bundles_post_ra>
